<compile_context>
chip_gen: v5e
topology: v5e:2x2
jax: 0.10.0
libtpu: 0.0.40
codegen_flags: <defaults>
</compile_context>

<pallas_src>
import functools

import numpy as np

import jax
import jax.numpy as jnp
from jax.experimental import pallas as pl
from jax.experimental.pallas import tpu as pltpu

_LANES = 128
_SUBLANES = 8


def _round_up(x: int, m: int) -> int:
    return ((x + m - 1) // m) * m


def _freq_bands(multires: int, log_sampling: bool):
    """Static Python tuple of frequencies, matching torch.linspace semantics."""
    max_freq = float(multires - 1)
    if log_sampling:
        bands = 2.0 ** np.linspace(0.0, max_freq, num=multires)
    else:
        bands = np.linspace(2.0 ** 0.0, 2.0 ** max_freq, num=multires)
    return tuple(float(f) for f in bands)


def _build_plan(freq_bands):
    """Static plan: (k, f_k, derive_next).  derive_next means frequency k+1 is
    exactly 2*f_k and its sin/cos are derived with ONE double-angle step."""
    plan = []
    K = len(freq_bands)
    k = 0
    while k < K:
        f = freq_bands[k]
        derive = (k + 1 < K) and (freq_bands[k + 1] == 2.0 * f)
        plan.append((k, f, derive))
        k += 2 if derive else 1
    return tuple(plan)


def _nerf_pe_kernel(x_ref, o_ref, *, plan):
    """One row-tile.

    x_ref: (tile_rows, 128)          lane-dense input block
    o_ref: (1 + 2*K, tile_rows, 128) lane-dense output slab

    o[0] = x; o[2k+1] = sin(f_k x); o[2k+2] = cos(f_k x).
    Every store is a full-width unmasked (tile_rows, 128) vst.
    """
    xv = x_ref[...]                       # hoist: single load of the block
    o_ref[0] = xv
    for k, f, derive in plan:
        xf = xv * jnp.asarray(f, dtype=xv.dtype)   # single mul per anchor freq
        s = jnp.sin(xf)
        c = jnp.cos(xf)
        o_ref[2 * k + 1] = s
        o_ref[2 * k + 2] = c
        if derive:
            # f_{k+1} == 2*f_k exactly: one double-angle step (halves sin/cos work)
            s2 = 2.0 * s
            o_ref[2 * k + 3] = s2 * c          # sin(2t) = 2 sin t cos t
            o_ref[2 * k + 4] = 1.0 - s2 * s    # cos(2t) = 1 - 2 sin^2 t


def nerf_positional_embedding(x, multires: int, log_sampling: bool = True, *,
                              max_tile_rows: int = 1024,
                              output_layout: str = "concat"):
    """Pallas equivalent of Nerf_positional_embedding(multires, log_sampling)(x).

    x: (1, N, D) or (N, D).
    output_layout:
      "concat" (default): (N, D*(1+2*multires)) with torch.cat(dim=1) channel order
                          [x, sin(f0 x), cos(f0 x), sin(f1 x), ...].
      "slab":             kernel-native (1+2*multires, N, D) layout — no extra HBM
                          pass; consumer absorbs the permutation (e.g. permute the
                          next Linear layer's weights once).
    """
    if x.ndim == 3 and x.shape[0] == 1:
        x = jnp.squeeze(x, axis=0)
    assert x.ndim == 2, f"Expected 2D input (got {x.ndim}D input)"
    N, D = x.shape
    itemsize = jnp.dtype(x.dtype).itemsize

    freq_bands = _freq_bands(multires, log_sampling)
    plan = _build_plan(freq_bands)
    n_parts = 1 + 2 * len(freq_bands)

    # ---- lane-dense flattening + adaptive tiling -------------------------------
    total = N * D
    rows = pl.cdiv(total, _LANES)
    # >=2 grid steps when there is enough work (both v7x TCs busy); last tile
    # nearly full (minimal padded output writes).  tile_rows capped at 1024.
    min_tiles = 2 if rows > _SUBLANES else 1
    n_tiles = max(pl.cdiv(rows, max_tile_rows), min_tiles)
    tile_rows = _round_up(pl.cdiv(rows, n_tiles), _SUBLANES)
    rows_pad = n_tiles * tile_rows

    x_flat = x.reshape(-1)
    pad = rows_pad * _LANES - total
    if pad:
        x_flat = jnp.pad(x_flat, (0, pad))
    x2d = x_flat.reshape(rows_pad, _LANES)

    kernel = functools.partial(_nerf_pe_kernel, plan=plan)

    # ---- VMEM budget: double-buffered blocks + elementwise temporaries + margin,
    #      clamped <= 48 MiB (safe on v7x's 64 MiB; trivial on v5e/v6e's 128 MiB).
    in_blk = tile_rows * _LANES * itemsize
    out_blk = n_parts * in_blk
    vmem_limit = int(min(48 * 2**20,
                         max((2 * (in_blk + out_blk) + 8 * in_blk) * 5 // 4,
                             16 * 2**20)))

    cost = pl.CostEstimate(
        flops=2 * len(freq_bands) * total,
        transcendentals=2 * len(freq_bands) * total,
        bytes_accessed=(1 + n_parts) * total * itemsize,
    )

    out = pl.pallas_call(
        kernel,
        out_shape=jax.ShapeDtypeStruct((n_parts, rows_pad, _LANES), x.dtype),
        grid_spec=pltpu.PrefetchScalarGridSpec(
            num_scalar_prefetch=0,
            grid=(n_tiles,),
            in_specs=[pl.BlockSpec((tile_rows, _LANES), lambda i: (i, 0))],
            out_specs=pl.BlockSpec((n_parts, tile_rows, _LANES), lambda i: (0, i, 0)),
        ),
        compiler_params=pltpu.CompilerParams(
            dimension_semantics=("parallel",),
            vmem_limit_bytes=vmem_limit,
        ),
        cost_estimate=cost,
    )(x2d)

    out = out.reshape(n_parts, rows_pad * _LANES)[:, :total]      # (P, N*D)

    if output_layout == "slab":
        # Review item 1, option (a): zero extra HBM traffic; consumer absorbs the
        # permutation (e.g. permute the first Linear layer's weight rows once).
        return out.reshape(n_parts, N, D)

    # Default: torch.cat(dim=1)-identical layout (costs one extra pass over the
    # n_parts-times-sized output; switch to output_layout="slab" to avoid it).
    out = out.reshape(n_parts, N, D)
    out = jnp.transpose(out, (1, 0, 2)).reshape(N, n_parts * D)
    return out


def _reference(x, multires, log_sampling=True):
    """Plain-JAX reference mirroring the PyTorch forward."""
    if x.ndim == 3 and x.shape[0] == 1:
        x = jnp.squeeze(x, axis=0)
    outs = [x]
    for f in _freq_bands(multires, log_sampling):
        outs.append(jnp.sin(x * f))
        outs.append(jnp.cos(x * f))
    return jnp.concatenate(outs, axis=1)


if __name__ == "__main__":
    key = jax.random.PRNGKey(0)
    # NeRF-style input: batch of 1, N=64 points, D=3 coordinates, multires=10
    multires = 10
    x = jax.random.normal(key, (1, 64, 3), dtype=jnp.float32)

    out = jax.block_until_ready(nerf_positional_embedding(x, multires, log_sampling=True))
    ref = _reference(x, multires, log_sampling=True)
    assert out.shape == (64, 3 * (1 + 2 * multires)), out.shape
    assert jnp.allclose(out, ref, atol=1e-5, rtol=1e-5), "mismatch vs reference"

    # non-divisible larger N: exercises cdiv/padding and the >=2 grid-step path
    x2 = jax.random.normal(jax.random.PRNGKey(1), (1, 1000, 3), dtype=jnp.float32)
    out2 = jax.block_until_ready(nerf_positional_embedding(x2, multires))
    ref2 = _reference(x2, multires)
    assert out2.shape == (1000, 63), out2.shape
    assert jnp.allclose(out2, ref2, atol=1e-5, rtol=1e-5), "mismatch vs reference (N=1000)"

    # linear sampling (no exact frequency doubles -> all-direct sin/cos path)
    x3 = jax.random.normal(jax.random.PRNGKey(2), (1, 80, 3), dtype=jnp.float32)
    out3 = jax.block_until_ready(nerf_positional_embedding(x3, 5, log_sampling=False))
    ref3 = _reference(x3, 5, log_sampling=False)
    assert out3.shape == (80, 3 * 11), out3.shape
    assert jnp.allclose(out3, ref3, atol=1e-5, rtol=1e-5), "mismatch vs reference (linear)"

    print("KERNEL_OK")
</pallas_src>

<mosaic_0001>
module attributes {stable_mosaic.version = 11 : i64} {
  func.func @_nerf_pe_kernel(%arg0: i32, %arg1: memref<8x128xf32, #tpu.memory_space<vmem>>, %arg2: memref<21x8x128xf32, #tpu.memory_space<vmem>>) attributes {dimension_semantics = [#tpu.dimension_semantics<parallel>], iteration_bounds = array<i64: 1>, scalar_prefetch = 0 : i64, scratch_operands = 0 : i64, tpu.core_type = #tpu.core_type<tc>, window_params = [{transform_indices = @transform_0, window_bounds = array<i64: 8, 128>}, {transform_indices = @transform_1, window_bounds = array<i64: 21, 8, 128>}]} {
    %c0 = arith.constant 0 : index
    %c0_0 = arith.constant 0 : index
    %0 = vector.load %arg1[%c0, %c0_0] : memref<8x128xf32, #tpu.memory_space<vmem>>, vector<8x128xf32>
    %c0_1 = arith.constant 0 : index
    %c0_2 = arith.constant 0 : index
    %c0_3 = arith.constant 0 : index
    %1 = vector.load %arg2[%c0_1, %c0_2, %c0_3] : memref<21x8x128xf32, #tpu.memory_space<vmem>>, vector<1x8x128xf32>
    %2 = vector.shape_cast %1 : vector<1x8x128xf32> to vector<8x128xf32>
    %3 = vector.shape_cast %0 : vector<8x128xf32> to vector<1x8x128xf32>
    tpu.vector_store %arg2[%c0_1, %c0_2, %c0_3], %3 {strides = array<i32>} : memref<21x8x128xf32, #tpu.memory_space<vmem>>, vector<1x8x128xf32>,
    %cst = arith.constant 1.000000e+00 : f32
    %4 = vector.broadcast %cst : f32 to vector<8x128xf32>
    %5 = arith.mulf %0, %4 : vector<8x128xf32>
    %6 = math.sin %5 : vector<8x128xf32>
    %7 = math.cos %5 : vector<8x128xf32>
    %c1 = arith.constant 1 : index
    %c0_4 = arith.constant 0 : index
    %c0_5 = arith.constant 0 : index
    %8 = vector.load %arg2[%c1, %c0_4, %c0_5] : memref<21x8x128xf32, #tpu.memory_space<vmem>>, vector<1x8x128xf32>
    %9 = vector.shape_cast %8 : vector<1x8x128xf32> to vector<8x128xf32>
    %10 = vector.shape_cast %6 : vector<8x128xf32> to vector<1x8x128xf32>
    tpu.vector_store %arg2[%c1, %c0_4, %c0_5], %10 {strides = array<i32>} : memref<21x8x128xf32, #tpu.memory_space<vmem>>, vector<1x8x128xf32>,
    %c2 = arith.constant 2 : index
    %c0_6 = arith.constant 0 : index
    %c0_7 = arith.constant 0 : index
    %11 = vector.load %arg2[%c2, %c0_6, %c0_7] : memref<21x8x128xf32, #tpu.memory_space<vmem>>, vector<1x8x128xf32>
    %12 = vector.shape_cast %11 : vector<1x8x128xf32> to vector<8x128xf32>
    %13 = vector.shape_cast %7 : vector<8x128xf32> to vector<1x8x128xf32>
    tpu.vector_store %arg2[%c2, %c0_6, %c0_7], %13 {strides = array<i32>} : memref<21x8x128xf32, #tpu.memory_space<vmem>>, vector<1x8x128xf32>,
    %cst_8 = arith.constant 2.000000e+00 : f32
    %14 = vector.broadcast %cst_8 : f32 to vector<8x128xf32>
    %15 = arith.mulf %14, %6 : vector<8x128xf32>
    %16 = arith.mulf %15, %7 : vector<8x128xf32>
    %c3 = arith.constant 3 : index
    %c0_9 = arith.constant 0 : index
    %c0_10 = arith.constant 0 : index
    %17 = vector.load %arg2[%c3, %c0_9, %c0_10] : memref<21x8x128xf32, #tpu.memory_space<vmem>>, vector<1x8x128xf32>
    %18 = vector.shape_cast %17 : vector<1x8x128xf32> to vector<8x128xf32>
    %19 = vector.shape_cast %16 : vector<8x128xf32> to vector<1x8x128xf32>
    tpu.vector_store %arg2[%c3, %c0_9, %c0_10], %19 {strides = array<i32>} : memref<21x8x128xf32, #tpu.memory_space<vmem>>, vector<1x8x128xf32>,
    %20 = arith.mulf %15, %6 : vector<8x128xf32>
    %cst_11 = arith.constant 1.000000e+00 : f32
    %21 = vector.broadcast %cst_11 : f32 to vector<8x128xf32>
    %22 = arith.subf %21, %20 : vector<8x128xf32>
    %c4 = arith.constant 4 : index
    %c0_12 = arith.constant 0 : index
    %c0_13 = arith.constant 0 : index
    %23 = vector.load %arg2[%c4, %c0_12, %c0_13] : memref<21x8x128xf32, #tpu.memory_space<vmem>>, vector<1x8x128xf32>
    %24 = vector.shape_cast %23 : vector<1x8x128xf32> to vector<8x128xf32>
    %25 = vector.shape_cast %22 : vector<8x128xf32> to vector<1x8x128xf32>
    tpu.vector_store %arg2[%c4, %c0_12, %c0_13], %25 {strides = array<i32>} : memref<21x8x128xf32, #tpu.memory_space<vmem>>, vector<1x8x128xf32>,
    %cst_14 = arith.constant 4.000000e+00 : f32
    %26 = vector.broadcast %cst_14 : f32 to vector<8x128xf32>
    %27 = arith.mulf %0, %26 : vector<8x128xf32>
    %28 = math.sin %27 : vector<8x128xf32>
    %29 = math.cos %27 : vector<8x128xf32>
    %c5 = arith.constant 5 : index
    %c0_15 = arith.constant 0 : index
    %c0_16 = arith.constant 0 : index
    %30 = vector.load %arg2[%c5, %c0_15, %c0_16] : memref<21x8x128xf32, #tpu.memory_space<vmem>>, vector<1x8x128xf32>
    %31 = vector.shape_cast %30 : vector<1x8x128xf32> to vector<8x128xf32>
    %32 = vector.shape_cast %28 : vector<8x128xf32> to vector<1x8x128xf32>
    tpu.vector_store %arg2[%c5, %c0_15, %c0_16], %32 {strides = array<i32>} : memref<21x8x128xf32, #tpu.memory_space<vmem>>, vector<1x8x128xf32>,
    %c6 = arith.constant 6 : index
    %c0_17 = arith.constant 0 : index
    %c0_18 = arith.constant 0 : index
    %33 = vector.load %arg2[%c6, %c0_17, %c0_18] : memref<21x8x128xf32, #tpu.memory_space<vmem>>, vector<1x8x128xf32>
    %34 = vector.shape_cast %33 : vector<1x8x128xf32> to vector<8x128xf32>
    %35 = vector.shape_cast %29 : vector<8x128xf32> to vector<1x8x128xf32>
    tpu.vector_store %arg2[%c6, %c0_17, %c0_18], %35 {strides = array<i32>} : memref<21x8x128xf32, #tpu.memory_space<vmem>>, vector<1x8x128xf32>,
    %cst_19 = arith.constant 2.000000e+00 : f32
    %36 = vector.broadcast %cst_19 : f32 to vector<8x128xf32>
    %37 = arith.mulf %36, %28 : vector<8x128xf32>
    %38 = arith.mulf %37, %29 : vector<8x128xf32>
    %c7 = arith.constant 7 : index
    %c0_20 = arith.constant 0 : index
    %c0_21 = arith.constant 0 : index
    %39 = vector.load %arg2[%c7, %c0_20, %c0_21] : memref<21x8x128xf32, #tpu.memory_space<vmem>>, vector<1x8x128xf32>
    %40 = vector.shape_cast %39 : vector<1x8x128xf32> to vector<8x128xf32>
    %41 = vector.shape_cast %38 : vector<8x128xf32> to vector<1x8x128xf32>
    tpu.vector_store %arg2[%c7, %c0_20, %c0_21], %41 {strides = array<i32>} : memref<21x8x128xf32, #tpu.memory_space<vmem>>, vector<1x8x128xf32>,
    %42 = arith.mulf %37, %28 : vector<8x128xf32>
    %cst_22 = arith.constant 1.000000e+00 : f32
    %43 = vector.broadcast %cst_22 : f32 to vector<8x128xf32>
    %44 = arith.subf %43, %42 : vector<8x128xf32>
    %c8 = arith.constant 8 : index
    %c0_23 = arith.constant 0 : index
    %c0_24 = arith.constant 0 : index
    %45 = vector.load %arg2[%c8, %c0_23, %c0_24] : memref<21x8x128xf32, #tpu.memory_space<vmem>>, vector<1x8x128xf32>
    %46 = vector.shape_cast %45 : vector<1x8x128xf32> to vector<8x128xf32>
    %47 = vector.shape_cast %44 : vector<8x128xf32> to vector<1x8x128xf32>
    tpu.vector_store %arg2[%c8, %c0_23, %c0_24], %47 {strides = array<i32>} : memref<21x8x128xf32, #tpu.memory_space<vmem>>, vector<1x8x128xf32>,
    %cst_25 = arith.constant 1.600000e+01 : f32
    %48 = vector.broadcast %cst_25 : f32 to vector<8x128xf32>
    %49 = arith.mulf %0, %48 : vector<8x128xf32>
    %50 = math.sin %49 : vector<8x128xf32>
    %51 = math.cos %49 : vector<8x128xf32>
    %c9 = arith.constant 9 : index
    %c0_26 = arith.constant 0 : index
    %c0_27 = arith.constant 0 : index
    %52 = vector.load %arg2[%c9, %c0_26, %c0_27] : memref<21x8x128xf32, #tpu.memory_space<vmem>>, vector<1x8x128xf32>
    %53 = vector.shape_cast %52 : vector<1x8x128xf32> to vector<8x128xf32>
    %54 = vector.shape_cast %50 : vector<8x128xf32> to vector<1x8x128xf32>
    tpu.vector_store %arg2[%c9, %c0_26, %c0_27], %54 {strides = array<i32>} : memref<21x8x128xf32, #tpu.memory_space<vmem>>, vector<1x8x128xf32>,
    %c10 = arith.constant 10 : index
    %c0_28 = arith.constant 0 : index
    %c0_29 = arith.constant 0 : index
    %55 = vector.load %arg2[%c10, %c0_28, %c0_29] : memref<21x8x128xf32, #tpu.memory_space<vmem>>, vector<1x8x128xf32>
    %56 = vector.shape_cast %55 : vector<1x8x128xf32> to vector<8x128xf32>
    %57 = vector.shape_cast %51 : vector<8x128xf32> to vector<1x8x128xf32>
    tpu.vector_store %arg2[%c10, %c0_28, %c0_29], %57 {strides = array<i32>} : memref<21x8x128xf32, #tpu.memory_space<vmem>>, vector<1x8x128xf32>,
    %cst_30 = arith.constant 2.000000e+00 : f32
    %58 = vector.broadcast %cst_30 : f32 to vector<8x128xf32>
    %59 = arith.mulf %58, %50 : vector<8x128xf32>
    %60 = arith.mulf %59, %51 : vector<8x128xf32>
    %c11 = arith.constant 11 : index
    %c0_31 = arith.constant 0 : index
    %c0_32 = arith.constant 0 : index
    %61 = vector.load %arg2[%c11, %c0_31, %c0_32] : memref<21x8x128xf32, #tpu.memory_space<vmem>>, vector<1x8x128xf32>
    %62 = vector.shape_cast %61 : vector<1x8x128xf32> to vector<8x128xf32>
    %63 = vector.shape_cast %60 : vector<8x128xf32> to vector<1x8x128xf32>
    tpu.vector_store %arg2[%c11, %c0_31, %c0_32], %63 {strides = array<i32>} : memref<21x8x128xf32, #tpu.memory_space<vmem>>, vector<1x8x128xf32>,
    %64 = arith.mulf %59, %50 : vector<8x128xf32>
    %cst_33 = arith.constant 1.000000e+00 : f32
    %65 = vector.broadcast %cst_33 : f32 to vector<8x128xf32>
    %66 = arith.subf %65, %64 : vector<8x128xf32>
    %c12 = arith.constant 12 : index
    %c0_34 = arith.constant 0 : index
    %c0_35 = arith.constant 0 : index
    %67 = vector.load %arg2[%c12, %c0_34, %c0_35] : memref<21x8x128xf32, #tpu.memory_space<vmem>>, vector<1x8x128xf32>
    %68 = vector.shape_cast %67 : vector<1x8x128xf32> to vector<8x128xf32>
    %69 = vector.shape_cast %66 : vector<8x128xf32> to vector<1x8x128xf32>
    tpu.vector_store %arg2[%c12, %c0_34, %c0_35], %69 {strides = array<i32>} : memref<21x8x128xf32, #tpu.memory_space<vmem>>, vector<1x8x128xf32>,
    %cst_36 = arith.constant 6.400000e+01 : f32
    %70 = vector.broadcast %cst_36 : f32 to vector<8x128xf32>
    %71 = arith.mulf %0, %70 : vector<8x128xf32>
    %72 = math.sin %71 : vector<8x128xf32>
    %73 = math.cos %71 : vector<8x128xf32>
    %c13 = arith.constant 13 : index
    %c0_37 = arith.constant 0 : index
    %c0_38 = arith.constant 0 : index
    %74 = vector.load %arg2[%c13, %c0_37, %c0_38] : memref<21x8x128xf32, #tpu.memory_space<vmem>>, vector<1x8x128xf32>
    %75 = vector.shape_cast %74 : vector<1x8x128xf32> to vector<8x128xf32>
    %76 = vector.shape_cast %72 : vector<8x128xf32> to vector<1x8x128xf32>
    tpu.vector_store %arg2[%c13, %c0_37, %c0_38], %76 {strides = array<i32>} : memref<21x8x128xf32, #tpu.memory_space<vmem>>, vector<1x8x128xf32>,
    %c14 = arith.constant 14 : index
    %c0_39 = arith.constant 0 : index
    %c0_40 = arith.constant 0 : index
    %77 = vector.load %arg2[%c14, %c0_39, %c0_40] : memref<21x8x128xf32, #tpu.memory_space<vmem>>, vector<1x8x128xf32>
    %78 = vector.shape_cast %77 : vector<1x8x128xf32> to vector<8x128xf32>
    %79 = vector.shape_cast %73 : vector<8x128xf32> to vector<1x8x128xf32>
    tpu.vector_store %arg2[%c14, %c0_39, %c0_40], %79 {strides = array<i32>} : memref<21x8x128xf32, #tpu.memory_space<vmem>>, vector<1x8x128xf32>,
    %cst_41 = arith.constant 2.000000e+00 : f32
    %80 = vector.broadcast %cst_41 : f32 to vector<8x128xf32>
    %81 = arith.mulf %80, %72 : vector<8x128xf32>
    %82 = arith.mulf %81, %73 : vector<8x128xf32>
    %c15 = arith.constant 15 : index
    %c0_42 = arith.constant 0 : index
    %c0_43 = arith.constant 0 : index
    %83 = vector.load %arg2[%c15, %c0_42, %c0_43] : memref<21x8x128xf32, #tpu.memory_space<vmem>>, vector<1x8x128xf32>
    %84 = vector.shape_cast %83 : vector<1x8x128xf32> to vector<8x128xf32>
    %85 = vector.shape_cast %82 : vector<8x128xf32> to vector<1x8x128xf32>
    tpu.vector_store %arg2[%c15, %c0_42, %c0_43], %85 {strides = array<i32>} : memref<21x8x128xf32, #tpu.memory_space<vmem>>, vector<1x8x128xf32>,
    %86 = arith.mulf %81, %72 : vector<8x128xf32>
    %cst_44 = arith.constant 1.000000e+00 : f32
    %87 = vector.broadcast %cst_44 : f32 to vector<8x128xf32>
    %88 = arith.subf %87, %86 : vector<8x128xf32>
    %c16 = arith.constant 16 : index
    %c0_45 = arith.constant 0 : index
    %c0_46 = arith.constant 0 : index
    %89 = vector.load %arg2[%c16, %c0_45, %c0_46] : memref<21x8x128xf32, #tpu.memory_space<vmem>>, vector<1x8x128xf32>
    %90 = vector.shape_cast %89 : vector<1x8x128xf32> to vector<8x128xf32>
    %91 = vector.shape_cast %88 : vector<8x128xf32> to vector<1x8x128xf32>
    tpu.vector_store %arg2[%c16, %c0_45, %c0_46], %91 {strides = array<i32>} : memref<21x8x128xf32, #tpu.memory_space<vmem>>, vector<1x8x128xf32>,
    %cst_47 = arith.constant 2.560000e+02 : f32
    %92 = vector.broadcast %cst_47 : f32 to vector<8x128xf32>
    %93 = arith.mulf %0, %92 : vector<8x128xf32>
    %94 = math.sin %93 : vector<8x128xf32>
    %95 = math.cos %93 : vector<8x128xf32>
    %c17 = arith.constant 17 : index
    %c0_48 = arith.constant 0 : index
    %c0_49 = arith.constant 0 : index
    %96 = vector.load %arg2[%c17, %c0_48, %c0_49] : memref<21x8x128xf32, #tpu.memory_space<vmem>>, vector<1x8x128xf32>
    %97 = vector.shape_cast %96 : vector<1x8x128xf32> to vector<8x128xf32>
    %98 = vector.shape_cast %94 : vector<8x128xf32> to vector<1x8x128xf32>
    tpu.vector_store %arg2[%c17, %c0_48, %c0_49], %98 {strides = array<i32>} : memref<21x8x128xf32, #tpu.memory_space<vmem>>, vector<1x8x128xf32>,
    %c18 = arith.constant 18 : index
    %c0_50 = arith.constant 0 : index
    %c0_51 = arith.constant 0 : index
    %99 = vector.load %arg2[%c18, %c0_50, %c0_51] : memref<21x8x128xf32, #tpu.memory_space<vmem>>, vector<1x8x128xf32>
    %100 = vector.shape_cast %99 : vector<1x8x128xf32> to vector<8x128xf32>
    %101 = vector.shape_cast %95 : vector<8x128xf32> to vector<1x8x128xf32>
    tpu.vector_store %arg2[%c18, %c0_50, %c0_51], %101 {strides = array<i32>} : memref<21x8x128xf32, #tpu.memory_space<vmem>>, vector<1x8x128xf32>,
    %cst_52 = arith.constant 2.000000e+00 : f32
    %102 = vector.broadcast %cst_52 : f32 to vector<8x128xf32>
    %103 = arith.mulf %102, %94 : vector<8x128xf32>
    %104 = arith.mulf %103, %95 : vector<8x128xf32>
    %c19 = arith.constant 19 : index
    %c0_53 = arith.constant 0 : index
    %c0_54 = arith.constant 0 : index
    %105 = vector.load %arg2[%c19, %c0_53, %c0_54] : memref<21x8x128xf32, #tpu.memory_space<vmem>>, vector<1x8x128xf32>
    %106 = vector.shape_cast %105 : vector<1x8x128xf32> to vector<8x128xf32>
    %107 = vector.shape_cast %104 : vector<8x128xf32> to vector<1x8x128xf32>
    tpu.vector_store %arg2[%c19, %c0_53, %c0_54], %107 {strides = array<i32>} : memref<21x8x128xf32, #tpu.memory_space<vmem>>, vector<1x8x128xf32>,
    %108 = arith.mulf %103, %94 : vector<8x128xf32>
    %cst_55 = arith.constant 1.000000e+00 : f32
    %109 = vector.broadcast %cst_55 : f32 to vector<8x128xf32>
    %110 = arith.subf %109, %108 : vector<8x128xf32>
    %c20 = arith.constant 20 : index
    %c0_56 = arith.constant 0 : index
    %c0_57 = arith.constant 0 : index
    %111 = vector.load %arg2[%c20, %c0_56, %c0_57] : memref<21x8x128xf32, #tpu.memory_space<vmem>>, vector<1x8x128xf32>
    %112 = vector.shape_cast %111 : vector<1x8x128xf32> to vector<8x128xf32>
    %113 = vector.shape_cast %110 : vector<8x128xf32> to vector<1x8x128xf32>
    tpu.vector_store %arg2[%c20, %c0_56, %c0_57], %113 {strides = array<i32>} : memref<21x8x128xf32, #tpu.memory_space<vmem>>, vector<1x8x128xf32>,
    return
  }
  func.func @transform_0(%arg0: i32) -> (i32, i32) {
    %c0_i32 = arith.constant 0 : i32
    %c0_i32_0 = arith.constant 0 : i32
    return %arg0, %c0_i32 : i32, i32
  }
  func.func @transform_1(%arg0: i32) -> (i32, i32, i32) {
    %c0_i32 = arith.constant 0 : i32
    %c0_i32_0 = arith.constant 0 : i32
    %c0_i32_1 = arith.constant 0 : i32
    return %c0_i32, %arg0, %c0_i32_0 : i32, i32, i32
  }
}

</mosaic_0001>

<bundles_post_ra>
// kernel: tpu_custom_call.1
= control target key start
LH: loop header
LB: loop body
LE: loop exit
PB: predicated region body
PF: predicated region fallthrough
CT: control target
= control target key end

     0   :  { %6 = vsyncpa [#allocation3], 0  ;;  %s2321_s0 = inlined_call_operand.hbm [shape: f32[8,128], index: 0, kind: input, shape index: {}]   ;;  %s2322_s1 = inlined_call_operand.hbm [shape: f32[21,8,128], index: 1, kind: output, shape index: {}]  }
   0x1   :  { %7 = vsyncpa [#allocation4], 0  ;;  %s13_s8 = sshll.u32 %s2321_s0, 4  ;;  %s1746_s9 = smov [#allocation2]   ;;  %s14_s8 = int_to_ptr.hbm [resolvable:$true] %s13_s8 }
   0x2   :  { %s15_s10 = sshll.u32 %s1746_s9, 4  ;;  %s16_s10 = int_to_ptr.vmem [resolvable:$true] %s15_s10 }
   0x3   :  { %18 = dma.hbm_to_vmem [thread:$0]  %s14_s8, 128, %s16_s10, [#allocation3]  }
   0x4   :  { %1742 = dma.done.wait [#allocation3], 128  }
   0x5   :  { %1743 = vsyncadd [#allocation3], 4294967168  ;;  %v1770_v0 = vld [vmem:[#allocation2] sm:$0xff]  ;;  %v1747_v25 = vmov 683565275   ;;  %s1754_s0 = smov [#allocation5]  }
   0x6   :  { %24 = vst [vmem:[#allocation5] sm:$0xff] %v1770_v0  ;;  %v25_v1 = vand.u32 2147483647, %v1770_v0  ;;  %v28_v2 = vand.u32 2139095040, %v1770_v0  ;;  %v1776_v3 = vmul.f32 4.0, %v1770_v0  ;;  %v1779_v4 = vmul.f32 16.0, %v1770_v0 }
   0x7   :  { %v1748_v27 = vmov 2475754826   ;;  %v1749_v29 = vmov 2131351028   ;;  %v1750_v31 = vmov 2102212464  }
   0x8   :  { %v29_v5 = vshrl.u32 %v28_v2, 23  ;;  %v32_v6 = vand.u32 8388607, %v25_v1  ;;  %v350_v7 = vand.u32 2139095040, %v1776_v3  ;;  %v347_v8 = vand.u32 2147483647, %v1776_v3 }
   0x9   :  { %v672_v9 = vand.u32 2139095040, %v1779_v4  ;;  %v1751_v33 = vmov 920167782   ;;  %v1752_v42 = vmov 1326507024   ;;  %s1638_s11 = sshll.u32 %s1754_s0, 4  ;;  %s1639_s11 = int_to_ptr.vmem [resolvable:$true] %s1638_s11 }
   0xa   :  { %v1653_v10 = vadd.s32 4294967169, %v29_v5  ;;  %v351_v11 = vshrl.u32 %v350_v7, 23  ;;  %v33_v12 = vor.u32 8388608, %v32_v6  ;;  %v354_v15 = vand.u32 8388607, %v347_v8  ;;  %s1640_s14 = sshll.u32 %s2322_s1, 4  ;;  %s1641_s14 = int_to_ptr.hbm [resolvable:$true] %s1640_s14 }
   0xb   :  { %v673_v16 = vshrl.u32 %v672_v9, 23  ;;  %s1755_s15 = smov 128   ;;  %s1756_s16 = smov 8  }
   0xc   :  { %v35_v13 = vadd.s32 1, %v1653_v10  ;;  %v1659_v14 = vadd.s32 4294967169, %v351_v11  ;;  %v1788_v19 = vshll.u32 %v33_v12, 8  ;;  %v355_v22 = vor.u32 8388608, %v354_v15 }
   0xd   :  { %v1790_v23 = vadd.s32 4294967169, %v673_v16 }
   0xe   :  { %vm36_vm0 = vcmp.gt.s32.totalorder %v35_v13, 0  ;;  %v357_v17 = vadd.s32 1, %v1659_v14  ;;  %v74_v35 = vand.u32 65535, %v1788_v19  ;;  %v75_v60 = vshrl.u32 %v1788_v19, 16 }
   0xf   :  { %v37_v18 = vsel %vm36_vm0, %v35_v13, 0  ;;  %v1811_v61 = vshll.u32 %v355_v22, 8 }
  0x10   :  { %v39_v20 = vand.u32 31, %v37_v18  ;;  %vm358_vm1 = vcmp.gt.s32.totalorder %v357_v17, 0  ;;  %v38_v21 = vshrl.u32 %v37_v18, 5 }
  0x11   :  { %v359_v36 = vsel %vm358_vm1, %v357_v17, 0 }
  0x12   :  { %v40_v24 = vsub.s32 32, %v39_v20  ;;  %v42_v26 = vshll.u32 %v1747_v25, %v39_v20  ;;  %v45_v28 = vshll.u32 %v1748_v27, %v39_v20  ;;  %v48_v30 = vshll.u32 %v1749_v29, %v39_v20 }
  0x13   :  { %v51_v32 = vshll.u32 %v1750_v31, %v39_v20  ;;  %v54_v34 = vshll.u32 %v1751_v33, %v39_v20  ;;  %vm57_vm2 = vcmp.lt.s32.totalorder %v38_v21, 1  ;;  %vm58_vm3 = vcmp.lt.s32.totalorder %v38_v21, 2 }
  0x14   :  { %v41_v37 = vshrl.u32 %v1747_v25, %v40_v24  ;;  %v43_v38 = vshrl.u32 %v1748_v27, %v40_v24  ;;  %v46_v39 = vshrl.u32 %v1749_v29, %v40_v24  ;;  %v49_v40 = vshrl.u32 %v1750_v31, %v40_v24 }
  0x15   :  { %v52_v41 = vshrl.u32 %v1751_v33, %v40_v24  ;;  %v55_v43 = vshrl.u32 %v1752_v42, %v40_v24  ;;  %vm60_vm4 = vcmp.lt.s32.totalorder %v38_v21, 4  ;;  %vm59_vm5 = vcmp.lt.s32.totalorder %v38_v21, 3 }
  0x16   :  { %v44_v44 = vor.u32 %v43_v38, %v42_v26  ;;  %v47_v45 = vor.u32 %v46_v39, %v45_v28  ;;  %v50_v46 = vor.u32 %v49_v40, %v48_v30  ;;  %v1805_v49 = vand.u32 31, %v359_v36 }
  0x17   :  { %v53_v47 = vor.u32 %v52_v41, %v51_v32  ;;  %v56_v48 = vor.u32 %v55_v43, %v54_v34  ;;  %v1818_v5 = vshrl.u32 %v359_v36, 5  ;;  %v1753_v43 = vmov 0  }
  0x18   :  { %v61_v50 = vsel %vm57_vm2, %v41_v37, %v44_v44  ;;  %v62_v51 = vsel %vm60_vm4, %v50_v46, 2102212464  ;;  %v65_v52 = vsel %vm57_vm2, %v44_v44, %v47_v45  ;;  %v69_v53 = vsel %vm57_vm2, %v47_v45, %v50_v46 }
  0x19   :  { %v63_v54 = vsel %vm59_vm5, %v47_v45, %v62_v51  ;;  %v66_v55 = vsel %vm60_vm4, %v53_v47, 920167782  ;;  %v70_v56 = vsel %vm60_vm4, %v56_v48, 1326507024  ;;  %v1808_v57 = vsub.s32 32, %v1805_v49 }
  0x1a   :  { %v67_v58 = vsel %vm59_vm5, %v50_v46, %v66_v55  ;;  %v71_v59 = vsel %vm59_vm5, %v53_v47, %v70_v56  ;;  %v1814_v62 = vsel %vm58_vm3, %v61_v50, %v63_v54  ;;  %v364_v11 = vshll.u32 %v1747_v25, %v1805_v49 }
  0x1b   :  { %v68_v63 = vsel %vm58_vm3, %v65_v52, %v67_v58  ;;  %v72_v2 = vsel %vm58_vm3, %v69_v53, %v71_v59  ;;  %v365_v12 = vshrl.u32 %v1748_v27, %v1808_v57  ;;  %v367_v13 = vshll.u32 %v1748_v27, %v1805_v49 }
  0x1c   :  { %v76_v6 = vand.u32 65535, %v72_v2  ;;  %v77_v7 = vshrl.u32 %v72_v2, 16  ;;  %v98_v9 = vand.u32 65535, %v68_v63  ;;  %v99_v10 = vshrl.u32 %v68_v63, 16 }
  0x1d   :  { %v368_v14 = vshrl.u32 %v1749_v29, %v1808_v57  ;;  %v370_v18 = vshll.u32 %v1749_v29, %v1805_v49  ;;  %v1830_v41 = vor.u32 %v365_v12, %v364_v11  ;;  %v373_v48 = vshll.u32 %v1750_v31, %v1805_v49 }
  0x1e   :  { %v78_v15 = vmul.u32 %v76_v6, %v74_v35  ;;  %v79_v16 = vmul.u32 %v77_v7, %v74_v35  ;;  %v80_v17 = vmul.u32 %v76_v6, %v75_v60  ;;  %v81_v20 = vmul.u32 %v77_v7, %v75_v60 }
  0x1f   :  { %v100_v21 = vmul.u32 %v98_v9, %v74_v35  ;;  %v101_v22 = vmul.u32 %v99_v10, %v74_v35  ;;  %v102_v24 = vmul.u32 %v98_v9, %v75_v60  ;;  %v103_v32 = vmul.u32 %v99_v10, %v75_v60 }
  0x20   :  { %v82_v26 = vshll.u32 %v79_v16, 16  ;;  %v83_v28 = vshrl.u32 %v79_v16, 16  ;;  %v84_v30 = vshll.u32 %v80_v17, 16  ;;  %v85_v34 = vshrl.u32 %v80_v17, 16 }
  0x21   :  { %v104_v36 = vshll.u32 %v101_v22, 16  ;;  %v105_v37 = vshrl.u32 %v101_v22, 16  ;;  %v106_v38 = vshll.u32 %v102_v24, 16  ;;  %v107_v40 = vshrl.u32 %v102_v24, 16 }
  0x22   :  { %vm86_vm6 = vc.u32 %v78_v15, %v82_v26  ;;  %v88_v39 = vadd.s32 %v82_v26, %v78_v15  ;;  %v371_v35 = vshrl.u32 %v1750_v31, %v1808_v57  ;;  %v369_v52 = vor.u32 %v368_v14, %v367_v13 }
  0x23   :  { %v87_v44 = vsel %vm86_vm6, 1, %v1753_v43  ;;  %vm108_vm7 = vc.u32 %v100_v21, %v104_v36  ;;  %v110_v45 = vadd.s32 %v104_v36, %v100_v21  ;;  %v374_v56 = vshrl.u32 %v1751_v33, %v1808_v57 }
  0x24   :  { %v89_v46 = vadd.s32 %v87_v44, %v81_v20  ;;  %vm90_vm8 = vc.u32 %v88_v39, %v84_v30  ;;  %v109_v47 = vsel %vm108_vm7, 1, %v1753_v43  ;;  %v372_v55 = vor.u32 %v371_v35, %v370_v18 }
  0x25   :  { %v91_v50 = vsel %vm90_vm8, 1, %v1753_v43  ;;  %v111_v51 = vadd.s32 %v109_v47, %v103_v32  ;;  %vm112_vm9 = vc.u32 %v110_v45, %v106_v38  ;;  %v376_v59 = vshll.u32 %v1751_v33, %v1805_v49 }
  0x26   :  { %v93_v53 = vadd.s32 %v91_v50, %v89_v46  ;;  %v113_v54 = vsel %vm112_vm9, 1, %v1753_v43  ;;  %v377_v60 = vshrl.u32 %v1752_v42, %v1808_v57  ;;  %vm379_vm10 = vcmp.lt.s32.totalorder %v1818_v5, 1 }
  0x27   :  { %v115_v58 = vadd.s32 %v113_v54, %v111_v51  ;;  %v1847_v2 = vadd.s32 %v110_v45, %v106_v38  ;;  %v375_v6 = vor.u32 %v374_v56, %v373_v48  ;;  %vm381_vm11 = vcmp.lt.s32.totalorder %v1818_v5, 3 }
  0x28   :  { %v94_v63 = vadd.s32 %v93_v53, %v83_v28  ;;  %v378_v9 = vor.u32 %v377_v60, %v376_v59  ;;  %vm380_vm12 = vcmp.lt.s32.totalorder %v1818_v5, 2  ;;  %vm382_vm13 = vcmp.lt.s32.totalorder %v1818_v5, 4 }
  0x29   :  { %v116_v7 = vadd.s32 %v115_v58, %v105_v37  ;;  %v387_v49 = vsel %vm379_vm10, %v1830_v41, %v369_v52  ;;  %v388_v11 = vsel %vm382_vm13, %v375_v6, 920167782  ;;  %v679_v12 = vadd.s32 1, %v1790_v23 }
  0x2a   :  { %v1852_v10 = vadd.s32 %v94_v63, %v85_v34  ;;  %v389_v14 = vsel %vm381_vm11, %v372_v55, %v388_v11  ;;  %v396_v15 = vand.u32 65535, %v1811_v61  ;;  %v397_v16 = vshrl.u32 %v1811_v61, 16 }
  0x2b   :  { %v117_v13 = vadd.s32 %v116_v7, %v107_v40  ;;  %v118_v17 = vmul.u32 %v1788_v19, %v1814_v62  ;;  %v390_v18 = vsel %vm380_vm12, %v387_v49, %v389_v14  ;;  %v391_v23 = vsel %vm379_vm10, %v369_v52, %v372_v55 }
  0x2c   :  { %vm120_vm14 = vc.u32 %v1852_v10, %v1847_v2  ;;  %v392_v21 = vsel %vm382_vm13, %v378_v9, 1326507024  ;;  %v420_v22 = vand.u32 65535, %v390_v18  ;;  %v421_v24 = vshrl.u32 %v390_v18, 16 }
  0x2d   :  { %v121_v20 = vadd.s32 1, %v117_v13  ;;  %v393_v26 = vsel %vm381_vm11, %v375_v6, %v392_v21  ;;  %vm680_vm15 = vcmp.gt.s32.totalorder %v679_v12, 0  ;;  %v363_v36 = vshrl.u32 %v1747_v25, %v1808_v57 }
  0x2e   :  { %v394_v19 = vsel %vm380_vm12, %v391_v23, %v393_v26  ;;  %v423_v62 = vmul.u32 %v421_v24, %v396_v15  ;;  %v422_v37 = vmul.u32 %v420_v22, %v396_v15  ;;  %v424_v38 = vmul.u32 %v420_v22, %v397_v16 }
  0x2f   :  { %v122_v28 = vsel %vm120_vm14, %v121_v20, %v117_v13  ;;  %v398_v32 = vand.u32 65535, %v394_v19  ;;  %v399_v34 = vshrl.u32 %v394_v19, 16  ;;  %v384_v46 = vsel %vm382_vm13, %v372_v55, 2102212464 }
  0x30   :  { %v123_v30 = vadd.s32 %v122_v28, %v118_v17  ;;  %v426_v39 = vshll.u32 %v423_v62, 16  ;;  %v428_v47 = vshll.u32 %v424_v38, 16  ;;  %v681_v48 = vsel %vm680_vm15, %v679_v12, 0 }
  0x31   :  { %v400_v44 = vmul.u32 %v398_v32, %v396_v15  ;;  %v401_v45 = vmul.u32 %v399_v34, %v396_v15  ;;  %v402_v35 = vmul.u32 %v398_v32, %v397_v16  ;;  %v403_v51 = vmul.u32 %v399_v34, %v397_v16 }
  0x32   :  { %v124_v40 = vadd.s32 536870912, %v123_v30  ;;  %v383_v57 = vsel %vm379_vm10, %v363_v36, %v1830_v41  ;;  %v425_v56 = vmul.u32 %v421_v24, %v397_v16  ;;  %vm430_vm0 = vc.u32 %v422_v37, %v426_v39 }
  0x33   :  { %v404_v53 = vshll.u32 %v401_v45, 16  ;;  %v406_v54 = vshll.u32 %v402_v35, 16  ;;  %v432_v58 = vadd.s32 %v426_v39, %v422_v37  ;;  %v385_v60 = vsel %vm381_vm11, %v369_v52, %v384_v46 }
  0x34   :  { %v1882_v50 = vshrl.u32 %v124_v40, 30  ;;  %v431_v6 = vsel %vm430_vm0, 1, %v1753_v43  ;;  %v683_v7 = vand.u32 31, %v681_v48  ;;  %v405_v49 = vshrl.u32 %v401_v45, 16 }
  0x35   :  { %vm408_vm1 = vc.u32 %v400_v44, %v404_v53  ;;  %v410_v55 = vadd.s32 %v404_v53, %v400_v44  ;;  %vm434_vm2 = vc.u32 %v432_v58, %v428_v47  ;;  %v427_v12 = vshrl.u32 %v423_v62, 16 }
  0x36   :  { %v126_v59 = vshll.u32 %v1882_v50, 30  ;;  %v409_v63 = vsel %vm408_vm1, 1, %v1753_v43  ;;  %v433_v13 = vadd.s32 %v431_v6, %v425_v56  ;;  %v435_v14 = vsel %vm434_vm2, 1, %v1753_v43 }
  0x37   :  { %v411_v11 = vadd.s32 %v409_v63, %v403_v51  ;;  %vm412_vm3 = vc.u32 %v410_v55, %v406_v54  ;;  %v407_v15 = vshrl.u32 %v402_v35, 16  ;;  %v386_v17 = vsel %vm380_vm12, %v383_v57, %v385_v60 }
  0x38   :  { %v127_v9 = vsub.s32 %v123_v30, %v126_v59  ;;  %v413_v41 = vsel %vm412_vm3, 1, %v1753_v43  ;;  %v429_v18 = vshrl.u32 %v424_v38, 16  ;;  %v437_v23 = vadd.s32 %v435_v14, %v433_v13 }
  0x39   :  { %v415_v16 = vadd.s32 %v413_v41, %v411_v11  ;;  %v1896_v22 = vadd.s32 %v432_v58, %v428_v47  ;;  %v684_v24 = vsub.s32 32, %v683_v7  ;;  %vm27_vm5 = vcmp.lt.s32.totalorder %v1770_v0, 0 }
  0x3a   :  { %vm128_vm4 = vcmp.lt.s32.totalorder %v127_v9, 0  ;;  %v129_v52 = vsub.s32 0, %v127_v9  ;;  %v438_v28 = vadd.s32 %v437_v23, %v427_v12  ;;  %v119_v19 = vadd.s32 %v1847_v2, %v1852_v10 }
  0x3b   :  { %v416_v21 = vadd.s32 %v415_v16, %v405_v49  ;;  %v440_v30 = vmul.u32 %v1811_v61, %v386_v17  ;;  %v669_v5 = vand.u32 2147483647, %v1779_v4  ;;  %v149_v34 = vsub.s32 4, %v1882_v50 }
  0x3c   :  { %v130_v20 = vsel %vm128_vm4, %v129_v52, %v127_v9  ;;  %v439_v36 = vadd.s32 %v438_v28, %v429_v18  ;;  %v1906_v37 = vshrl.u32 %v681_v48, 5  ;;  %v689_v38 = vshll.u32 %v1748_v27, %v683_v7 }
  0x3d   :  { %v131_v26 = vclz %v130_v20  ;;  %v1901_v62 = vadd.s32 %v416_v21, %v407_v15  ;;  %v690_v39 = vshrl.u32 %v1749_v29, %v684_v24  ;;  %v692_v2 = vshll.u32 %v1749_v29, %v683_v7 }
  0x3e   :  { %v443_v10 = vadd.s32 1, %v439_v36  ;;  %v693_v61 = vshrl.u32 %v1750_v31, %v684_v24  ;;  %v695_v40 = vshll.u32 %v1750_v31, %v683_v7  ;;  %v696_v45 = vshrl.u32 %v1751_v33, %v684_v24 }
  0x3f   :  { %v1654_v32 = vadd.s32 4294967294, %v131_v26  ;;  %vm442_vm6 = vc.u32 %v1901_v62, %v1896_v22  ;;  %v698_v35 = vshll.u32 %v1751_v33, %v683_v7  ;;  %v699_v46 = vshrl.u32 %v1752_v42, %v684_v24 }
  0x40   :  { %v444_v53 = vsel %vm442_vm6, %v443_v10, %v439_v36  ;;  %v150_v54 = vsel %vm27_vm5, %v149_v34, %v1882_v50  ;;  %v676_v56 = vand.u32 8388607, %v669_v5  ;;  %v686_v60 = vshll.u32 %v1747_v25, %v683_v7 }
  0x41   :  { %vm1655_vm7 = vcmp.lt.s32.totalorder %v1654_v32, 0  ;;  %v445_v57 = vadd.s32 %v444_v53, %v440_v30  ;;  %v687_v55 = vshrl.u32 %v1748_v27, %v684_v24  ;;  %v1925_v6 = vor.u32 %v690_v39, %v689_v38 }
  0x42   :  { %v134_v44 = vsel %vm1655_vm7, 0, %v1654_v32  ;;  %v697_v49 = vor.u32 %v696_v45, %v695_v40  ;;  %v700_v12 = vor.u32 %v699_v46, %v698_v35  ;;  %vm701_vm8 = vcmp.lt.s32.totalorder %v1906_v37, 1 }
  0x43   :  { %v135_v47 = vsub.s32 32, %v134_v44  ;;  %v136_v48 = vshll.u32 %v127_v9, %v134_v44  ;;  %v139_v51 = vsub.s32 4294967266, %v134_v44  ;;  %v446_v63 = vadd.s32 536870912, %v445_v57 }
  0x44   :  { %v694_v9 = vor.u32 %v693_v61, %v692_v2  ;;  %vm1930_vm9 = vcmp.le.f32.partialorder %v25_v1, 0.7853982  ;;  %v677_v7 = vor.u32 8388608, %v676_v56  ;;  %vm704_vm10 = vcmp.lt.s32.totalorder %v1906_v37, 4 }
  0x45   :  { %v137_v58 = vshrl.u32 %v119_v19, %v135_v47  ;;  %v140_v59 = vadd.s32 127, %v139_v51  ;;  %v1934_v13 = vshrl.u32 %v446_v63, 30  ;;  %v688_v15 = vor.u32 %v687_v55, %v686_v60 }
  0x46   :  { %vm703_vm11 = vcmp.lt.s32.totalorder %v1906_v37, 3  ;;  %v152_v16 = vsel %vm1930_vm9, 0, %v150_v54  ;;  %vm702_vm12 = vcmp.lt.s32.totalorder %v1906_v37, 2  ;;  %v713_v1 = vsel %vm701_vm8, %v1925_v6, %v694_v9 }
  0x47   :  { %v138_v11 = vor.u32 %v137_v58, %v136_v48  ;;  %v141_v41 = vshll.u32 %v140_v59, 23  ;;  %v448_v17 = vshll.u32 %v1934_v13, 30  ;;  %v710_v23 = vsel %vm704_vm10, %v697_v49, 920167782 }
  0x48   :  { %v714_v20 = vsel %vm704_vm10, %v700_v12, 1326507024  ;;  %v685_v26 = vshrl.u32 %v1747_v25, %v684_v24  ;;  %v1954_v19 = vshll.u32 %v677_v7, 8  ;;  %v169_v32 = vadd.s32 3, %v152_v16 }
  0x49   :  { %v142_v14 = vor.u32 4788187, %v141_v41  ;;  %v145_v52 = vcvt.s32.f32 %v138_v11  ;;  %v1949_v21 = vsub.s32 %v445_v57, %v448_v17  ;;  %v715_v28 = vsel %vm703_vm11, %v697_v49, %v714_v20 }
  0x4a   :  { %v709_v34 = vsel %vm701_vm8, %v688_v15, %v1925_v6  ;;  %v716_v36 = vsel %vm702_vm12, %v713_v1, %v715_v28  ;;  %v711_v24 = vsel %vm703_vm11, %v694_v9, %v710_v23  ;;  %v718_v39 = vand.u32 65535, %v1954_v19 }
  0x4b   :  { %v143_v18 = vand.u32 2147483647, %v142_v14  ;;  %vm450_vm13 = vcmp.lt.s32.totalorder %v1949_v21, 0  ;;  %v451_v38 = vsub.s32 0, %v1949_v21  ;;  %v1967_v10 = vshrl.u32 %v1954_v19, 16 }
  0x4c   :  { %v720_v61 = vand.u32 65535, %v716_v36  ;;  %v721_v40 = vshrl.u32 %v716_v36, 16  ;;  %v441_v44 = vadd.s32 %v1896_v22, %v1901_v62  ;;  %v1974_v46 = vand.u32 3, %v169_v32 }
  0x4d   :  { %v146_v30 = vmul.f32 %v145_v52, %v143_v18  ;;  %v452_v45 = vsel %vm450_vm13, %v451_v38, %v1949_v21  ;;  %v712_v48 = vsel %vm702_vm12, %v709_v34, %v711_v24  ;;  %v1990_v57 = vand.u32 3, %v152_v16 }
  0x4e   :  { %v453_v47 = vclz %v452_v45  ;;  %v722_v53 = vmul.u32 %v720_v61, %v718_v39  ;;  %v1983_v54 = vmul.u32 %v721_v40, %v718_v39  ;;  %v1986_v22 = vmul.u32 %v720_v61, %v1967_v10 }
  0x4f   :  { %v147_v2 = vxor.u32 2147483648, %v146_v30  ;;  %v705_v58 = vsel %vm701_vm8, %v685_v26, %v688_v15  ;;  %vm349_vm14 = vcmp.lt.s32.totalorder %v1776_v3, 0  ;;  %v706_v59 = vsel %vm704_vm10, %v694_v9, 2102212464 }
  0x50   :  { %v1660_v56 = vadd.s32 4294967294, %v453_v47  ;;  %v726_v60 = vshll.u32 %v1983_v54, 16  ;;  %v742_v55 = vand.u32 65535, %v712_v48  ;;  %v743_v63 = vshrl.u32 %v712_v48, 16 }
  0x51   :  { %v148_v35 = vsel %vm27_vm5, %v147_v2, %v146_v30  ;;  %v728_v41 = vshll.u32 %v1986_v22, 16  ;;  %v725_v50 = vmul.u32 %v721_v40, %v1967_v10  ;;  %vm175_vm1 = vcmp.eq.s32.totalorder %v1974_v46, 2 }
  0x52   :  { %v1981_v51 = vsel %vm1930_vm9, %v1770_v0, %v148_v35  ;;  %vm1661_vm15 = vcmp.lt.s32.totalorder %v1660_v56, 0  ;;  %vm730_vm0 = vc.u32 %v722_v53, %v726_v60  ;;  %v732_v7 = vadd.s32 %v726_v60, %v722_v53 }
  0x53   :  { %v153_v62 = vmul.f32 %v1981_v51, %v1981_v51  ;;  %v456_v12 = vsel %vm1661_vm15, 0, %v1660_v56  ;;  %vm329_vm2 = vcmp.eq.s32.totalorder %v1990_v57, 2  ;;  %vm2005_vm3 = vcmp.le.f32.partialorder %v347_v8, 0.7853982 }
  0x54   :  { %v457_v15 = vsub.s32 32, %v456_v12  ;;  %v458_v16 = vshll.u32 %v1949_v21, %v456_v12  ;;  %v461_v17 = vsub.s32 4294967266, %v456_v12  ;;  %v471_v1 = vsub.s32 4, %v1934_v13 }
  0x55   :  { %v154_v49 = vmul.f32 -0.001358992, %v153_v62  ;;  %v161_v11 = vmul.f32 -0.00019511016, %v153_v62  ;;  %v731_v18 = vsel %vm730_vm0, 1, %v1753_v43  ;;  %v745_v23 = vmul.u32 %v743_v63, %v718_v39 }
  0x56   :  { %v459_v28 = vshrl.u32 %v441_v44, %v457_v15  ;;  %vm2011_vm4 = vc.u32 %v732_v7, %v728_v41  ;;  %vm172_vm5 = vcmp.eq.s32.totalorder %v1974_v46, 0  ;;  %vm326_vm6 = vcmp.eq.s32.totalorder %v1990_v57, 0 }
  0x57   :  { %v155_v14 = vadd.f32 0.041655596, %v154_v49  ;;  %v162_v52 = vadd.f32 0.008332121, %v161_v11  ;;  %v462_v8 = vadd.s32 127, %v461_v17  ;;  %v707_v30 = vsel %vm703_vm11, %v1925_v6, %v706_v59 }
  0x58   :  { %v733_v32 = vadd.s32 %v731_v18, %v725_v50  ;;  %v744_v34 = vmul.u32 %v742_v55, %v718_v39  ;;  %vm171_vm7 = vcmp.lt.s32.totalorder %v1974_v46, 2  ;;  %vm325_vm8 = vcmp.lt.s32.totalorder %v1990_v57, 2 }
  0x59   :  { %v156_v20 = vmul.f32 %v155_v14, %v153_v62  ;;  %v163_v26 = vmul.f32 %v162_v52, %v153_v62  ;;  %v460_v24 = vor.u32 %v459_v28, %v458_v16  ;;  %v746_v2 = vmul.u32 %v742_v55, %v1967_v10 }
  0x5a   :  { %vm168_vm9 = vweird.f32 %v1770_v0  ;;  %v463_v61 = vshll.u32 %v462_v8, 23  ;;  %v727_v40 = vshrl.u32 %v1983_v54, 16  ;;  %v735_v6 = vsel %vm2011_vm4, 1, %v1753_v43 }
  0x5b   :  { %v157_v36 = vadd.f32 -0.4999988, %v156_v20  ;;  %v164_v38 = vadd.f32 -0.16666654, %v163_v26  ;;  %v748_v44 = vshll.u32 %v745_v23, 16  ;;  %v472_v35 = vsel %vm349_vm14, %v471_v1, %v1934_v13 }
  0x5c   :  { %v2033_v47 = vsel %vm702_vm12, %v705_v58, %v707_v30  ;;  %v464_v48 = vor.u32 4788187, %v463_v61  ;;  %v467_v53 = vcvt.s32.f32 %v460_v24  ;;  %v737_v56 = vadd.s32 %v735_v6, %v733_v32 }
  0x5d   :  { %v158_v39 = vmul.f32 %v157_v36, %v153_v62  ;;  %v165_v45 = vmul.f32 %v164_v38, %v153_v62  ;;  %v747_v54 = vmul.u32 %v743_v63, %v1967_v10  ;;  %v729_v55 = vshrl.u32 %v1986_v22, 16 }
  0x5e   :  { %v750_v49 = vshll.u32 %v746_v2, 16  ;;  %v465_v11 = vand.u32 2147483647, %v464_v48  ;;  %v738_v62 = vadd.s32 %v737_v56, %v727_v40  ;;  %vm752_vm10 = vc.u32 %v744_v34, %v748_v44 }
  0x5f   :  { %v159_v59 = vadd.f32 1.0, %v158_v39  ;;  %v166_v60 = vadd.f32 1.0, %v165_v45  ;;  %v754_v41 = vadd.s32 %v748_v44, %v744_v34  ;;  %v474_v37 = vsel %vm2005_vm3, 0, %v472_v35 }
  0x60   :  { %v753_v58 = vsel %vm752_vm10, 1, %v1753_v43  ;;  %v468_v50 = vmul.f32 %v467_v53, %v465_v11  ;;  %v749_v7 = vshrl.u32 %v745_v23, 16  ;;  %v2046_v15 = vadd.s32 %v738_v62, %v729_v55 }
  0x61   :  { %v167_v13 = vmul.f32 %v166_v60, %v1981_v51  ;;  %v176_v12 = vxor.u32 2147483648, %v159_v59  ;;  %v755_v10 = vadd.s32 %v753_v58, %v747_v54  ;;  %vm756_vm11 = vc.u32 %v754_v41, %v750_v49 }
  0x62   :  { %v757_v52 = vsel %vm756_vm11, 1, %v1753_v43  ;;  %v469_v51 = vxor.u32 2147483648, %v468_v50  ;;  %v751_v16 = vshrl.u32 %v746_v2, 16  ;;  %v758_v23 = vadd.s32 %v754_v41, %v750_v49 }
  0x63   :  { %v173_v63 = vxor.u32 2147483648, %v167_v13  ;;  %v177_v22 = vsel %vm175_vm1, %v176_v12, %v167_v13  ;;  %v331_v14 = vsel %vm329_vm2, %v176_v12, %v167_v13  ;;  %v759_v17 = vadd.s32 %v757_v52, %v755_v10 }
  0x64   :  { %v2053_v20 = vmul.f32 64.0, %v1770_v0  ;;  %v470_v21 = vsel %vm349_vm14, %v469_v51, %v468_v50  ;;  %v491_v57 = vadd.s32 3, %v474_v37  ;;  %v762_v24 = vmul.u32 %v1954_v19, %v2033_v47 }
  0x65   :  { %v174_v1 = vsel %vm172_vm5, %v159_v59, %v173_v63  ;;  %v328_v18 = vsel %vm326_vm6, %v159_v59, %v173_v63  ;;  %v760_v8 = vadd.s32 %v759_v17, %v749_v7  ;;  %v473_v34 = vsel %vm2005_vm3, %v1776_v3, %v470_v21 }
  0x66   :  { %v178_v26 = vsel %vm171_vm7, %v174_v1, %v177_v22  ;;  %v332_v28 = vsel %vm325_vm8, %v328_v18, %v331_v14  ;;  %v475_v36 = vmul.f32 %v473_v34, %v473_v34  ;;  %vm764_vm12 = vc.u32 %v2046_v15, %v758_v23 }
  0x67   :  { %v179_v30 = vsel %vm168_vm9, nan, %v178_v26  ;;  %v333_v32 = vsel %vm168_vm9, nan, %v332_v28  ;;  %v761_v38 = vadd.s32 %v760_v8, %v751_v16  ;;  %v994_v2 = vand.u32 2139095040, %v2053_v20 }
  0x68   :  { %335 = vst [vmem:[#allocation5 + $0x8] sm:$0xff] %v179_v30  ;;  %v338_v46 = vmul.f32 2.0, %v179_v30  ;;  %v476_v6 = vmul.f32 -0.001358992, %v475_v36  ;;  %v483_v44 = vmul.f32 -0.00019511016, %v475_v36  ;;  %vm490_vm13 = vweird.f32 %v1776_v3 }
  0x69   :  { %337 = vst [vmem:[#allocation5 + $0x10] sm:$0xff] %v333_v32  ;;  %v765_v39 = vadd.s32 1, %v761_v38  ;;  %v991_v9 = vand.u32 2147483647, %v2053_v20  ;;  %v995_v45 = vshrl.u32 %v994_v2, 23  ;;  %v492_v56 = vand.u32 3, %v491_v57 }
  0x6a   :  { %v339_v61 = vmul.f32 %v338_v46, %v333_v32  ;;  %v342_v40 = vmul.f32 %v338_v46, %v179_v30  ;;  %v477_v48 = vadd.f32 0.041655596, %v476_v6  ;;  %v484_v53 = vadd.f32 0.008332121, %v483_v44 }
  0x6b   :  { %v766_v54 = vsel %vm764_vm12, %v765_v39, %v761_v38  ;;  %v1671_v59 = vadd.s32 4294967169, %v995_v45  ;;  %v2074_v19 = vmul.f32 256.0, %v1770_v0  ;;  %v998_v49 = vand.u32 8388607, %v991_v9 }
  0x6c   :  { %341 = vst [vmem:[#allocation5 + $0x18] sm:$0xff] %v339_v61  ;;  %v343_v35 = vsub.f32 1.0, %v342_v40  ;;  %v478_v47 = vmul.f32 %v477_v48, %v475_v36  ;;  %v485_v60 = vmul.f32 %v484_v53, %v475_v36  ;;  %v767_v55 = vadd.s32 %v766_v54, %v762_v24 }
  0x6d   :  { %v1001_v11 = vadd.s32 1, %v1671_v59  ;;  %v646_v13 = vand.u32 3, %v474_v37  ;;  %vm493_vm14 = vcmp.lt.s32.totalorder %v492_v56, 2  ;;  %v1316_v58 = vand.u32 2139095040, %v2074_v19 }
  0x6e   :  { %345 = vst [vmem:[#allocation5 + $0x20] sm:$0xff] %v343_v35  ;;  %v479_v62 = vadd.f32 -0.4999988, %v478_v47  ;;  %v486_v41 = vadd.f32 -0.16666654, %v485_v60  ;;  %v768_v12 = vadd.s32 536870912, %v767_v55  ;;  %v2082_v37 = vadd.s32 %v758_v23, %v2046_v15 }
  0x6f   :  { %vm1002_vm15 = vcmp.gt.s32.totalorder %v1001_v11, 0  ;;  %vm494_vm0 = vcmp.eq.s32.totalorder %v492_v56, 0  ;;  %vm497_vm1 = vcmp.eq.s32.totalorder %v492_v56, 2  ;;  %v999_v63 = vor.u32 8388608, %v998_v49 }
  0x70   :  { %v480_v0 = vmul.f32 %v479_v62, %v475_v36  ;;  %v487_v50 = vmul.f32 %v486_v41, %v475_v36  ;;  %v769_v7 = vshrl.u32 %v768_v12, 30  ;;  %v1003_v10 = vsel %vm1002_vm15, %v1001_v11, 0 }
  0x71   :  { %v1005_v22 = vand.u32 31, %v1003_v10  ;;  %vm647_vm2 = vcmp.lt.s32.totalorder %v646_v13, 2  ;;  %vm648_vm3 = vcmp.eq.s32.totalorder %v646_v13, 0  ;;  %vm651_vm4 = vcmp.eq.s32.totalorder %v646_v13, 2 }
  0x72   :  { %v481_v14 = vadd.f32 1.0, %v480_v0  ;;  %v488_v52 = vadd.f32 1.0, %v487_v50  ;;  %v770_v51 = vshll.u32 %v769_v7, 30  ;;  %vm671_vm5 = vcmp.lt.s32.totalorder %v1779_v4, 0 }
  0x73   :  { %v2084_v16 = vsub.s32 32, %v1005_v22  ;;  %v1317_v26 = vshrl.u32 %v1316_v58, 23  ;;  %v793_v28 = vsub.s32 4, %v769_v7  ;;  %v2088_v21 = vshrl.u32 %v1003_v10, 5 }
  0x74   :  { %v489_v17 = vmul.f32 %v488_v52, %v473_v34  ;;  %v498_v1 = vxor.u32 2147483648, %v481_v14  ;;  %v2086_v18 = vsub.s32 %v767_v55, %v770_v51  ;;  %v1008_v8 = vshll.u32 %v1747_v25, %v1005_v22 }
  0x75   :  { %v2091_v30 = vshll.u32 %v999_v63, 8  ;;  %v1009_v23 = vshrl.u32 %v1748_v27, %v2084_v16  ;;  %v1011_v34 = vshll.u32 %v1748_v27, %v1005_v22  ;;  %v1014_v38 = vshll.u32 %v1749_v29, %v1005_v22 }
  0x76   :  { %v495_v32 = vxor.u32 2147483648, %v489_v17  ;;  %v499_v46 = vsel %vm497_vm1, %v498_v1, %v489_v17  ;;  %v653_v36 = vsel %vm651_vm4, %v498_v1, %v489_v17  ;;  %vm772_vm6 = vcmp.lt.s32.totalorder %v2086_v18, 0 }
  0x77   :  { %v773_v15 = vsub.s32 0, %v2086_v18  ;;  %vm2104_vm7 = vcmp.le.f32.partialorder %v669_v5, 0.7853982  ;;  %v1012_v61 = vshrl.u32 %v1749_v29, %v2084_v16  ;;  %v1015_v40 = vshrl.u32 %v1750_v31, %v2084_v16 }
  0x78   :  { %v496_v57 = vsel %vm494_vm0, %v481_v14, %v495_v32  ;;  %v650_v24 = vsel %vm648_vm3, %v481_v14, %v495_v32  ;;  %v1017_v45 = vshll.u32 %v1750_v31, %v1005_v22  ;;  %v1018_v53 = vshrl.u32 %v1751_v33, %v2084_v16 }
  0x79   :  { %v500_v6 = vsel %vm493_vm14, %v496_v57, %v499_v46  ;;  %v654_v44 = vsel %vm647_vm2, %v650_v24, %v653_v36  ;;  %v774_v39 = vsel %vm772_vm6, %v773_v15, %v2086_v18  ;;  %v1020_v56 = vshll.u32 %v1751_v33, %v1005_v22 }
  0x7a   :  { %v501_v5 = vsel %vm490_vm13, nan, %v500_v6  ;;  %v655_v35 = vsel %vm490_vm13, nan, %v654_v44  ;;  %v775_v48 = vclz %v774_v39  ;;  %v1021_v59 = vshrl.u32 %v1752_v42, %v2084_v16 }
  0x7b   :  { %657 = vst [vmem:[#allocation5 + $0x28] sm:$0xff] %v501_v5  ;;  %v660_v54 = vmul.f32 2.0, %v501_v5  ;;  %v1313_v47 = vand.u32 2147483647, %v2074_v19  ;;  %v794_v55 = vsel %vm671_vm5, %v793_v28, %v769_v7  ;;  %v1040_v3 = vand.u32 65535, %v2091_v30 }
  0x7c   :  { %659 = vst [vmem:[#allocation5 + $0x30] sm:$0xff] %v655_v35  ;;  %v1666_v60 = vadd.s32 4294967294, %v775_v48  ;;  %v1677_v49 = vadd.s32 4294967169, %v1317_v26  ;;  %v1010_v41 = vor.u32 %v1009_v23, %v1008_v8  ;;  %v1013_v13 = vor.u32 %v1012_v61, %v1011_v34 }
  0x7d   :  { %v661_v11 = vmul.f32 %v660_v54, %v655_v35  ;;  %v664_v62 = vmul.f32 %v660_v54, %v501_v5  ;;  %v1016_v12 = vor.u32 %v1015_v40, %v1014_v38  ;;  %v1019_v58 = vor.u32 %v1018_v53, %v1017_v45 }
  0x7e   :  { %vm1667_vm8 = vcmp.lt.s32.totalorder %v1666_v60, 0  ;;  %vm1023_vm9 = vcmp.lt.s32.totalorder %v2088_v21, 1  ;;  %v1022_v10 = vor.u32 %v1021_v59, %v1020_v56  ;;  %vm1026_vm10 = vcmp.lt.s32.totalorder %v2088_v21, 4 }
  0x7f   :  { %663 = vst [vmem:[#allocation5 + $0x38] sm:$0xff] %v661_v11  ;;  %v665_v0 = vsub.f32 1.0, %v664_v62  ;;  %v778_v50 = vsel %vm1667_vm8, 0, %v1666_v60  ;;  %vm1025_vm11 = vcmp.lt.s32.totalorder %v2088_v21, 3  ;;  %v2135_v14 = vsel %vm2104_vm7, 0, %v794_v55 }
  0x80   :  { %v779_v63 = vsub.s32 32, %v778_v50  ;;  %v780_v7 = vshll.u32 %v2086_v18, %v778_v50  ;;  %v783_v22 = vsub.s32 4294967266, %v778_v50  ;;  %vm1024_vm12 = vcmp.lt.s32.totalorder %v2088_v21, 2 }
  0x81   :  { %667 = vst [vmem:[#allocation5 + $0x40] sm:$0xff] %v665_v0  ;;  %v1031_v52 = vsel %vm1023_vm9, %v1010_v41, %v1013_v13  ;;  %v1041_v51 = vshrl.u32 %v2091_v30, 16  ;;  %v1032_v18 = vsel %vm1026_vm10, %v1019_v58, 920167782  ;;  %v1035_v26 = vsel %vm1023_vm9, %v1013_v13, %v1016_v12 }
  0x82   :  { %v781_v17 = vshrl.u32 %v2082_v37, %v779_v63  ;;  %v784_v1 = vadd.s32 127, %v783_v22  ;;  %v1007_v28 = vshrl.u32 %v1747_v25, %v2084_v16  ;;  %v1028_v8 = vsel %vm1026_vm10, %v1016_v12, 2102212464 }
  0x83   :  { %v1033_v32 = vsel %vm1025_vm11, %v1016_v12, %v1032_v18  ;;  %v1036_v46 = vsel %vm1026_vm10, %v1022_v10, 1326507024  ;;  %v813_v34 = vadd.s32 3, %v2135_v14  ;;  %v2163_v38 = vand.u32 8388607, %v1313_v47 }
  0x84   :  { %v782_v37 = vor.u32 %v781_v17, %v780_v7  ;;  %v785_v36 = vshll.u32 %v784_v1, 23  ;;  %v1034_v15 = vsel %vm1024_vm12, %v1031_v52, %v1033_v32  ;;  %v1037_v23 = vsel %vm1025_vm11, %v1019_v58, %v1036_v46 }
  0x85   :  { %v1038_v16 = vsel %vm1024_vm12, %v1035_v26, %v1037_v23  ;;  %v1323_v57 = vadd.s32 1, %v1677_v49  ;;  %v1027_v44 = vsel %vm1023_vm9, %v1007_v28, %v1010_v41  ;;  %v1029_v39 = vsel %vm1025_vm11, %v1013_v13, %v1028_v8 }
  0x86   :  { %v786_v24 = vor.u32 4788187, %v785_v36  ;;  %v789_v61 = vcvt.s32.f32 %v782_v37  ;;  %v1042_v40 = vand.u32 65535, %v1038_v16  ;;  %v1043_v6 = vshrl.u32 %v1038_v16, 16 }
  0x87   :  { %v1064_v45 = vand.u32 65535, %v1034_v15  ;;  %v1065_v5 = vshrl.u32 %v1034_v15, 16  ;;  %vm1324_vm13 = vcmp.gt.s32.totalorder %v1323_v57, 0  ;;  %v2169_v12 = vand.u32 3, %v813_v34 }
  0x88   :  { %v787_v35 = vand.u32 2147483647, %v786_v24  ;;  %v1044_v48 = vmul.u32 %v1042_v40, %v1040_v3  ;;  %v1045_v53 = vmul.u32 %v1043_v6, %v1040_v3  ;;  %v1046_v54 = vmul.u32 %v1042_v40, %v1041_v51 }
  0x89   :  { %v1047_v56 = vmul.u32 %v1043_v6, %v1041_v51  ;;  %v1067_v59 = vmul.u32 %v1065_v5, %v1040_v3  ;;  %v1068_v60 = vmul.u32 %v1064_v45, %v1041_v51  ;;  %v1066_v62 = vmul.u32 %v1064_v45, %v1040_v3 }
  0x8a   :  { %v790_v55 = vmul.f32 %v789_v61, %v787_v35  ;;  %v1048_v49 = vshll.u32 %v1045_v53, 16  ;;  %v1050_v11 = vshll.u32 %v1046_v54, 16  ;;  %v2173_v41 = vsel %vm1024_vm12, %v1027_v44, %v1029_v39 }
  0x8b   :  { %v1069_v13 = vmul.u32 %v1065_v5, %v1041_v51  ;;  %v1321_v58 = vor.u32 8388608, %v2163_v38  ;;  %v1070_v10 = vshll.u32 %v1067_v59, 16  ;;  %v1049_v63 = vshrl.u32 %v1045_v53, 16 }
  0x8c   :  { %v791_v0 = vxor.u32 2147483648, %v790_v55  ;;  %vm1052_vm14 = vc.u32 %v1044_v48, %v1048_v49  ;;  %v1054_v50 = vadd.s32 %v1048_v49, %v1044_v48  ;;  %v1072_v22 = vshll.u32 %v1068_v60, 16 }
  0x8d   :  { %v1053_v7 = vsel %vm1052_vm14, 1, %v1753_v43  ;;  %v1325_v52 = vsel %vm1324_vm13, %v1323_v57, 0  ;;  %vm1074_vm0 = vc.u32 %v1066_v62, %v1070_v10  ;;  %v1076_v18 = vadd.s32 %v1070_v10, %v1066_v62 }
  0x8e   :  { %v792_v3 = vsel %vm671_vm5, %v791_v0, %v790_v55  ;;  %v1055_v17 = vadd.s32 %v1053_v7, %v1047_v56  ;;  %vm1056_vm15 = vc.u32 %v1054_v50, %v1050_v11  ;;  %v1075_v1 = vsel %vm1074_vm0, 1, %v1753_v43 }
  0x8f   :  { %v2183_v21 = vsel %vm2104_vm7, %v1779_v4, %v792_v3  ;;  %v1057_v51 = vsel %vm1056_vm15, 1, %v1753_v43  ;;  %v1051_v28 = vshrl.u32 %v1046_v54, 16  ;;  %v1077_v32 = vadd.s32 %v1075_v1, %v1069_v13 }
  0x90   :  { %v797_v26 = vmul.f32 %v2183_v21, %v2183_v21  ;;  %v1059_v8 = vadd.s32 %v1057_v51, %v1055_v17  ;;  %v2190_v46 = vand.u32 3, %v2135_v14  ;;  %v1071_v37 = vshrl.u32 %v1067_v59, 16 }
  0x91   :  { %vm1078_vm1 = vc.u32 %v1076_v18, %v1072_v22  ;;  %v1327_v36 = vand.u32 31, %v1325_v52  ;;  %v1073_v16 = vshrl.u32 %v1068_v60, 16  ;;  %v2193_v57 = vadd.s32 %v1076_v18, %v1072_v22 }
  0x92   :  { %v798_v2 = vmul.f32 -0.001358992, %v797_v26  ;;  %v805_v15 = vmul.f32 -0.00019511016, %v797_v26  ;;  %v1060_v23 = vadd.s32 %v1059_v8, %v1049_v63  ;;  %v1079_v34 = vsel %vm1078_vm1, 1, %v1753_v43 }
  0x93   :  { %v1081_v24 = vadd.s32 %v1079_v34, %v1077_v32  ;;  %v2195_v61 = vsub.s32 32, %v1327_v36  ;;  %v1084_v14 = vmul.u32 %v2091_v30, %v2173_v41  ;;  %vm819_vm2 = vcmp.eq.s32.totalorder %v2169_v12, 2 }
  0x94   :  { %v799_v40 = vadd.f32 0.041655596, %v798_v2  ;;  %v806_v6 = vadd.f32 0.008332121, %v805_v15  ;;  %v2197_v44 = vadd.s32 %v1060_v23, %v1051_v28  ;;  %v2202_v45 = vshrl.u32 %v1325_v52, 5 }
  0x95   :  { %v1082_v39 = vadd.s32 %v1081_v24, %v1071_v37  ;;  %v1330_v5 = vshll.u32 %v1747_v25, %v1327_v36  ;;  %v1333_v35 = vshll.u32 %v1748_v27, %v1327_v36  ;;  %v1331_v54 = vshrl.u32 %v1748_v27, %v2195_v61 }
  0x96   :  { %v800_v48 = vmul.f32 %v799_v40, %v797_v26  ;;  %v807_v53 = vmul.f32 %v806_v6, %v797_v26  ;;  %v1334_v56 = vshrl.u32 %v1749_v29, %v2195_v61  ;;  %vm816_vm3 = vcmp.eq.s32.totalorder %v2169_v12, 0 }
  0x97   :  { %v1083_v30 = vadd.s32 %v1082_v39, %v1073_v16  ;;  %vm1086_vm4 = vc.u32 %v2197_v44, %v2193_v57  ;;  %v1336_v59 = vshll.u32 %v1749_v29, %v1327_v36  ;;  %v1337_v60 = vshrl.u32 %v1750_v31, %v2195_v61 }
  0x98   :  { %v801_v55 = vadd.f32 -0.4999988, %v800_v48  ;;  %v808_v49 = vadd.f32 -0.16666654, %v807_v53  ;;  %vm815_vm5 = vcmp.lt.s32.totalorder %v2169_v12, 2  ;;  %vm969_vm6 = vcmp.lt.s32.totalorder %v2190_v46, 2 }
  0x99   :  { %v1339_v27 = vshll.u32 %v1750_v31, %v1327_v36  ;;  %v1340_v11 = vshrl.u32 %v1751_v33, %v2195_v61  ;;  %vm970_vm7 = vcmp.eq.s32.totalorder %v2190_v46, 0  ;;  %v1087_v62 = vadd.s32 1, %v1083_v30 }
  0x9a   :  { %v1342_v41 = vshll.u32 %v1751_v33, %v1327_v36  ;;  %v1343_v29 = vshrl.u32 %v1752_v42, %v2195_v61  ;;  %v802_v13 = vmul.f32 %v801_v55, %v797_v26  ;;  %v809_v0 = vmul.f32 %v808_v49, %v797_v26 }
  0x9b   :  { %v2225_v50 = vor.u32 %v1331_v54, %v1330_v5  ;;  %v2227_v10 = vor.u32 %v1334_v56, %v1333_v35  ;;  %v1088_v31 = vsel %vm1086_vm4, %v1087_v62, %v1083_v30  ;;  %v2232_v63 = vor.u32 %v1337_v60, %v1336_v59 }
  0x9c   :  { %v1341_v7 = vor.u32 %v1340_v11, %v1339_v27  ;;  %v1344_v22 = vor.u32 %v1343_v29, %v1342_v41  ;;  %v803_v52 = vadd.f32 1.0, %v802_v13  ;;  %v810_v3 = vadd.f32 1.0, %v809_v0 }
  0x9d   :  { %v1089_v33 = vadd.s32 %v1088_v31, %v1084_v14  ;;  %vm1345_vm8 = vcmp.lt.s32.totalorder %v2202_v45, 1  ;;  %vm973_vm9 = vcmp.eq.s32.totalorder %v2190_v46, 2  ;;  %vm1346_vm10 = vcmp.lt.s32.totalorder %v2202_v45, 2 }
  0x9e   :  { %vm1348_vm11 = vcmp.lt.s32.totalorder %v2202_v45, 4  ;;  %v2240_v42 = vshll.u32 %v1321_v58, 8  ;;  %v811_v17 = vmul.f32 %v810_v3, %v2183_v21  ;;  %v820_v51 = vxor.u32 2147483648, %v803_v52 }
  0x9f   :  { %v1090_v1 = vadd.s32 536870912, %v1089_v33  ;;  %vm1347_vm12 = vcmp.lt.s32.totalorder %v2202_v45, 3  ;;  %v1353_v18 = vsel %vm1345_vm8, %v2225_v50, %v2227_v10  ;;  %v1354_v26 = vsel %vm1348_vm11, %v1341_v7, 920167782 }
  0xa0   :  { %v1357_v38 = vsel %vm1345_vm8, %v2227_v10, %v2232_v63  ;;  %v1358_v58 = vsel %vm1348_vm11, %v1344_v22, 1326507024  ;;  %v817_v21 = vxor.u32 2147483648, %v811_v17  ;;  %v821_v28 = vsel %vm819_vm2, %v820_v51, %v811_v17 }
  0xa1   :  { %v975_v8 = vsel %vm973_vm9, %v820_v51, %v811_v17  ;;  %v2258_v32 = vshrl.u32 %v1090_v1, 30  ;;  %vm812_vm13 = vweird.f32 %v1779_v4  ;;  %v1355_v37 = vsel %vm1347_vm12, %v2232_v63, %v1354_v26 }
  0xa2   :  { %v1359_v36 = vsel %vm1347_vm12, %v1341_v7, %v1358_v58  ;;  %v818_v2 = vsel %vm816_vm3, %v803_v52, %v817_v21  ;;  %v972_v15 = vsel %vm970_vm7, %v803_v52, %v817_v21  ;;  %v1362_v34 = vand.u32 65535, %v2240_v42 }
  0xa3   :  { %v1092_v23 = vshll.u32 %v2258_v32, 30  ;;  %v822_v4 = vsel %vm815_vm5, %v818_v2, %v821_v28  ;;  %v976_v16 = vsel %vm969_vm6, %v972_v15, %v975_v8  ;;  %v1356_v24 = vsel %vm1346_vm10, %v1353_v18, %v1355_v37 }
  0xa4   :  { %v1360_v40 = vsel %vm1346_vm10, %v1357_v38, %v1359_v36  ;;  %v823_v6 = vsel %vm812_vm13, nan, %v822_v4  ;;  %v977_v14 = vsel %vm812_vm13, nan, %v976_v16  ;;  %v1363_v5 = vshrl.u32 %v2240_v42, 16 }
  0xa5   :  { %v1093_v39 = vsub.s32 %v1089_v33, %v1092_v23  ;;  %979 = vst [vmem:[#allocation5 + $0x48] sm:$0xff] %v823_v6  ;;  %v982_v35 = vmul.f32 2.0, %v823_v6  ;;  %v1364_v48 = vand.u32 65535, %v1360_v40  ;;  %v1365_v53 = vshrl.u32 %v1360_v40, 16 }
  0xa6   :  { %981 = vst [vmem:[#allocation5 + $0x50] sm:$0xff] %v977_v14  ;;  %v1387_v46 = vshrl.u32 %v1356_v24, 16  ;;  %v1386_v49 = vand.u32 65535, %v1356_v24  ;;  %v1085_v7 = vadd.s32 %v2193_v57, %v2197_v44  ;;  %v1329_v57 = vshrl.u32 %v1747_v25, %v2195_v61 }
  0xa7   :  { %vm1094_vm14 = vcmp.lt.s32.totalorder %v1093_v39, 0  ;;  %v1095_v12 = vsub.s32 0, %v1093_v39  ;;  %v983_v54 = vmul.f32 %v982_v35, %v977_v14  ;;  %v986_v56 = vmul.f32 %v982_v35, %v823_v6 }
  0xa8   :  { %v1366_v30 = vmul.u32 %v1364_v48, %v1362_v34  ;;  %v1367_v59 = vmul.u32 %v1365_v53, %v1362_v34  ;;  %v1368_v55 = vmul.u32 %v1364_v48, %v1363_v5  ;;  %v1369_v62 = vmul.u32 %v1365_v53, %v1363_v5 }
  0xa9   :  { %v1096_v60 = vsel %vm1094_vm14, %v1095_v12, %v1093_v39  ;;  %985 = vst [vmem:[#allocation5 + $0x58] sm:$0xff] %v983_v54  ;;  %v987_v27 = vsub.f32 1.0, %v986_v56  ;;  %v1389_v13 = vmul.u32 %v1387_v46, %v1362_v34  ;;  %v1388_v52 = vmul.u32 %v1386_v49, %v1362_v34 }
  0xaa   :  { %v1097_v11 = vclz %v1096_v60  ;;  %v1370_v41 = vshll.u32 %v1367_v59, 16  ;;  %v1372_v29 = vshll.u32 %v1368_v55, 16  ;;  %v1390_v3 = vmul.u32 %v1386_v49, %v1363_v5 }
  0xab   :  { %989 = vst [vmem:[#allocation5 + $0x60] sm:$0xff] %v987_v27  ;;  %v1392_v17 = vshll.u32 %v1389_v13, 16  ;;  %v1371_v1 = vshrl.u32 %v1367_v59, 16  ;;  %v1391_v26 = vmul.u32 %v1387_v46, %v1363_v5  ;;  %v1350_v36 = vsel %vm1348_vm11, %v2232_v63, 2102212464 }
  0xac   :  { %v1672_v0 = vadd.s32 4294967294, %v1097_v11  ;;  %vm1374_vm15 = vc.u32 %v1366_v30, %v1370_v41  ;;  %v1376_v31 = vadd.s32 %v1370_v41, %v1366_v30  ;;  %v1394_v44 = vshll.u32 %v1390_v3, 16 }
  0xad   :  { %v1375_v22 = vsel %vm1374_vm15, 1, %v1753_v43  ;;  %vm1396_vm2 = vc.u32 %v1388_v52, %v1392_v17  ;;  %v1373_v2 = vshrl.u32 %v1368_v55, 16  ;;  %v1398_v23 = vadd.s32 %v1392_v17, %v1388_v52 }
  0xae   :  { %vm1673_vm0 = vcmp.lt.s32.totalorder %v1672_v0, 0  ;;  %v1377_v33 = vadd.s32 %v1375_v22, %v1369_v62  ;;  %vm1378_vm1 = vc.u32 %v1376_v31, %v1372_v29  ;;  %v1397_v15 = vsel %vm1396_vm2, 1, %v1753_v43 }
  0xaf   :  { %v1100_v51 = vsel %vm1673_vm0, 0, %v1672_v0  ;;  %v1379_v18 = vsel %vm1378_vm1, 1, %v1753_v43  ;;  %v1399_v24 = vadd.s32 %v1397_v15, %v1391_v26  ;;  %v1349_v25 = vsel %vm1345_vm8, %v1329_v57, %v2225_v50 }
  0xb0   :  { %v1101_v38 = vsub.s32 32, %v1100_v51  ;;  %v1102_v58 = vshll.u32 %v1093_v39, %v1100_v51  ;;  %v1105_v21 = vsub.s32 4294967266, %v1100_v51  ;;  %v1381_v28 = vadd.s32 %v1379_v18, %v1377_v33 }
  0xb1   :  { %v1393_v61 = vshrl.u32 %v1389_v13, 16  ;;  %vm1400_vm3 = vc.u32 %v1398_v23, %v1394_v44  ;;  %v1351_v63 = vsel %vm1347_vm12, %v2227_v10, %v1350_v36  ;;  %v1395_v39 = vshrl.u32 %v1390_v3, 16 }
  0xb2   :  { %v1103_v8 = vshrl.u32 %v1085_v7, %v1101_v38  ;;  %v1106_v37 = vadd.s32 127, %v1105_v21  ;;  %v1382_v16 = vadd.s32 %v1381_v28, %v1371_v1  ;;  %v1401_v14 = vsel %vm1400_vm3, 1, %v1753_v43 }
  0xb3   :  { %v1403_v5 = vadd.s32 %v1401_v14, %v1399_v24  ;;  %v1402_v53 = vadd.s32 %v1398_v23, %v1394_v44  ;;  %v1352_v12 = vsel %vm1346_vm10, %v1349_v25, %v1351_v63  ;;  %vm993_vm4 = vcmp.lt.s32.totalorder %v2053_v20, 0 }
  0xb4   :  { %v1104_v34 = vor.u32 %v1103_v8, %v1102_v58  ;;  %v1107_v4 = vshll.u32 %v1106_v37, 23  ;;  %v1383_v48 = vadd.s32 %v1382_v16, %v1373_v2  ;;  %v1115_v54 = vsub.s32 4, %v2258_v32 }
  0xb5   :  { %v1404_v46 = vadd.s32 %v1403_v5, %v1393_v61  ;;  %vm992_vm5 = vcmp.le.f32.partialorder %v991_v9, 0.7853982  ;;  %v1406_v43 = vmul.u32 %v2240_v42, %v1352_v12  ;;  %vm1134_vm14 = vweird.f32 %v2053_v20 }
  0xb6   :  { %v1108_v40 = vor.u32 4788187, %v1107_v4  ;;  %v1111_v6 = vcvt.s32.f32 %v1104_v34  ;;  %vm1408_vm6 = vc.u32 %v1383_v48, %v1402_v53  ;;  %v1116_v60 = vsel %vm993_vm4, %v1115_v54, %v2258_v32 }
  0xb7   :  { %v1405_v56 = vadd.s32 %v1404_v46, %v1395_v39  ;;  %v1118_v11 = vsel %vm992_vm5, 0, %v1116_v60  ;;  %v1407_v2 = vadd.s32 %v1402_v53, %v1383_v48  ;;  %vm1315_vm0 = vcmp.lt.s32.totalorder %v2074_v19, 0 }
  0xb8   :  { %v1109_v35 = vand.u32 2147483647, %v1108_v40  ;;  %v1135_v31 = vadd.s32 3, %v1118_v11  ;;  %v1290_v17 = vand.u32 3, %v1118_v11  ;;  %vm1314_vm1 = vcmp.le.f32.partialorder %v1313_v47, 0.7853982 }
  0xb9   :  { %v1409_v30 = vadd.s32 1, %v1405_v56 }
  0xba   :  { %v1112_v50 = vmul.f32 %v1111_v6, %v1109_v35  ;;  %v1136_v33 = vand.u32 3, %v1135_v31  ;;  %vm1295_vm9 = vcmp.eq.s32.totalorder %v1290_v17, 2  ;;  %vm1292_vm12 = vcmp.eq.s32.totalorder %v1290_v17, 0 }
  0xbb   :  { %v1410_v55 = vsel %vm1408_vm6, %v1409_v30, %v1405_v56  ;;  %vm1291_vm13 = vcmp.lt.s32.totalorder %v1290_v17, 2 }
  0xbc   :  { %v1113_v10 = vxor.u32 2147483648, %v1112_v50  ;;  %v1411_v27 = vadd.s32 %v1410_v55, %v1406_v43  ;;  %vm1141_vm8 = vcmp.eq.s32.totalorder %v1136_v33, 2  ;;  %vm1137_vm10 = vcmp.lt.s32.totalorder %v1136_v33, 2 }
  0xbd   :  { %vm1138_vm11 = vcmp.eq.s32.totalorder %v1136_v33, 0 }
  0xbe   :  { %v1114_v59 = vsel %vm993_vm4, %v1113_v10, %v1112_v50  ;;  %v1412_v29 = vadd.s32 536870912, %v1411_v27 }
  0xbf   :  { %v1117_v45 = vsel %vm992_vm5, %v2053_v20, %v1114_v59 }
  0xc0   :  { %v1119_v49 = vmul.f32 %v1117_v45, %v1117_v45  ;;  %v2307_v9 = vshrl.u32 %v1412_v29, 30 }
  0xc2   :  { %v1120_v62 = vmul.f32 -0.001358992, %v1119_v49  ;;  %v1127_v41 = vmul.f32 -0.00019511016, %v1119_v49  ;;  %v1414_v22 = vshll.u32 %v2307_v9, 30  ;;  %v1437_v56 = vsub.s32 4, %v2307_v9 }
  0xc4   :  { %v1121_v13 = vadd.f32 0.041655596, %v1120_v62  ;;  %v1128_v0 = vadd.f32 0.008332121, %v1127_v41  ;;  %v1415_v3 = vsub.s32 %v1411_v27, %v1414_v22  ;;  %v1438_v30 = vsel %vm1315_vm0, %v1437_v56, %v2307_v9 }
  0xc6   :  { %v1122_v42 = vmul.f32 %v1121_v13, %v1119_v49  ;;  %v1129_v7 = vmul.f32 %v1128_v0, %v1119_v49  ;;  %vm1416_vm7 = vcmp.lt.s32.totalorder %v1415_v3, 0  ;;  %v1417_v18 = vsub.s32 0, %v1415_v3 }
  0xc8   :  { %v1123_v52 = vadd.f32 -0.4999988, %v1122_v42  ;;  %v1130_v32 = vadd.f32 -0.16666654, %v1129_v7  ;;  %v1418_v58 = vsel %vm1416_vm7, %v1417_v18, %v1415_v3 }
  0xc9   :  { %v1419_v21 = vclz %v1418_v58 }
  0xca   :  { %v1124_v51 = vmul.f32 %v1123_v52, %v1119_v49  ;;  %v1131_v1 = vmul.f32 %v1130_v32, %v1119_v49 }
  0xcb   :  { %v1678_v44 = vadd.s32 4294967294, %v1419_v21 }
  0xcc   :  { %v1125_v26 = vadd.f32 1.0, %v1124_v51  ;;  %v1132_v38 = vadd.f32 1.0, %v1131_v1 }
  0xcd   :  { %vm1679_vm15 = vcmp.lt.s32.totalorder %v1678_v44, 0 }
  0xce   :  { %v1133_v28 = vmul.f32 %v1132_v38, %v1117_v45  ;;  %v1142_v57 = vxor.u32 2147483648, %v1125_v26  ;;  %v1422_v34 = vsel %vm1679_vm15, 0, %v1678_v44  ;;  %v1440_v45 = vsel %vm1314_vm1, 0, %v1438_v30 }
  0xcf   :  { %v1423_v24 = vsub.s32 32, %v1422_v34  ;;  %v1424_v25 = vshll.u32 %v1415_v3, %v1422_v34  ;;  %v1427_v6 = vsub.s32 4294967266, %v1422_v34  ;;  %v1457_v62 = vadd.s32 3, %v1440_v45 }
  0xd0   :  { %v1139_v8 = vxor.u32 2147483648, %v1133_v28  ;;  %v1143_v37 = vsel %vm1141_vm8, %v1142_v57, %v1133_v28  ;;  %v1297_v36 = vsel %vm1295_vm9, %v1142_v57, %v1133_v28  ;;  %v1612_v42 = vand.u32 3, %v1440_v45 }
  0xd1   :  { %v1425_v14 = vshrl.u32 %v1407_v2, %v1423_v24  ;;  %v1428_v39 = vadd.s32 127, %v1427_v6  ;;  %v1458_v31 = vand.u32 3, %v1457_v62  ;;  %vm1456_vm8 = vweird.f32 %v2074_v19 }
  0xd2   :  { %v1140_v15 = vsel %vm1138_vm11, %v1125_v26, %v1139_v8  ;;  %v1294_v23 = vsel %vm1292_vm12, %v1125_v26, %v1139_v8  ;;  %vm1617_vm3 = vcmp.eq.s32.totalorder %v1612_v42, 2  ;;  %vm1614_vm6 = vcmp.eq.s32.totalorder %v1612_v42, 0 }
  0xd3   :  { %v1144_v4 = vsel %vm1137_vm10, %v1140_v15, %v1143_v37  ;;  %v1298_v16 = vsel %vm1291_vm13, %v1294_v23, %v1297_v36  ;;  %v1426_v20 = vor.u32 %v1425_v14, %v1424_v25  ;;  %v1429_v48 = vshll.u32 %v1428_v39, 23 }
  0xd4   :  { %v1145_v61 = vsel %vm1134_vm14, nan, %v1144_v4  ;;  %v1299_v40 = vsel %vm1134_vm14, nan, %v1298_v16  ;;  %vm1463_vm2 = vcmp.eq.s32.totalorder %v1458_v31, 2  ;;  %vm1459_vm4 = vcmp.lt.s32.totalorder %v1458_v31, 2 }
  0xd5   :  { %1301 = vst [vmem:[#allocation5 + $0x68] sm:$0xff] %v1145_v61  ;;  %v1304_v63 = vmul.f32 2.0, %v1145_v61  ;;  %v1430_v12 = vor.u32 4788187, %v1429_v48  ;;  %v1433_v46 = vcvt.s32.f32 %v1426_v20  ;;  %vm1460_vm5 = vcmp.eq.s32.totalorder %v1458_v31, 0 }
  0xd6   :  { %1303 = vst [vmem:[#allocation5 + $0x70] sm:$0xff] %v1299_v40  ;;  %vm1613_vm7 = vcmp.lt.s32.totalorder %v1612_v42, 2 }
  0xd7   :  { %v1305_v5 = vmul.f32 %v1304_v63, %v1299_v40  ;;  %v1308_v35 = vmul.f32 %v1304_v63, %v1145_v61  ;;  %v1431_v50 = vand.u32 2147483647, %v1430_v12 }
  0xd9   :  { %1307 = vst [vmem:[#allocation5 + $0x78] sm:$0xff] %v1305_v5  ;;  %v1309_v53 = vsub.f32 1.0, %v1308_v35  ;;  %v1434_v54 = vmul.f32 %v1433_v46, %v1431_v50 }
  0xdb   :  { %1311 = vst [vmem:[#allocation5 + $0x80] sm:$0xff] %v1309_v53  ;;  %v1435_v10 = vxor.u32 2147483648, %v1434_v54 }
  0xdd   :  { %v1436_v43 = vsel %vm1315_vm0, %v1435_v10, %v1434_v54 }
  0xde   :  { %v1439_v59 = vsel %vm1314_vm1, %v2074_v19, %v1436_v43 }
  0xdf   :  { %v1441_v60 = vmul.f32 %v1439_v59, %v1439_v59 }
  0xe1   :  { %v1442_v55 = vmul.f32 -0.001358992, %v1441_v60  ;;  %v1449_v49 = vmul.f32 -0.00019511016, %v1441_v60 }
  0xe3   :  { %v1443_v27 = vadd.f32 0.041655596, %v1442_v55  ;;  %v1450_v11 = vadd.f32 0.008332121, %v1449_v49 }
  0xe5   :  { %v1444_v41 = vmul.f32 %v1443_v27, %v1441_v60  ;;  %v1451_v29 = vmul.f32 %v1450_v11, %v1441_v60 }
  0xe7   :  { %v1445_v13 = vadd.f32 -0.4999988, %v1444_v41  ;;  %v1452_v0 = vadd.f32 -0.16666654, %v1451_v29 }
  0xe9   :  { %v1446_v47 = vmul.f32 %v1445_v13, %v1441_v60  ;;  %v1453_v7 = vmul.f32 %v1452_v0, %v1441_v60 }
  0xeb   :  { %v1447_v22 = vadd.f32 1.0, %v1446_v47  ;;  %v1454_v52 = vadd.f32 1.0, %v1453_v7 }
  0xed   :  { %v1455_v9 = vmul.f32 %v1454_v52, %v1439_v59  ;;  %v1464_v32 = vxor.u32 2147483648, %v1447_v22 }
  0xef   :  { %v1461_v3 = vxor.u32 2147483648, %v1455_v9  ;;  %v1465_v33 = vsel %vm1463_vm2, %v1464_v32, %v1455_v9  ;;  %v1619_v17 = vsel %vm1617_vm3, %v1464_v32, %v1455_v9 }
  0xf1   :  { %v1462_v51 = vsel %vm1460_vm5, %v1447_v22, %v1461_v3  ;;  %v1616_v1 = vsel %vm1614_vm6, %v1447_v22, %v1461_v3 }
  0xf2   :  { %v1466_v18 = vsel %vm1459_vm4, %v1462_v51, %v1465_v33  ;;  %v1620_v26 = vsel %vm1613_vm7, %v1616_v1, %v1619_v17 }
  0xf3   :  { %v1467_v38 = vsel %vm1456_vm8, nan, %v1466_v18  ;;  %v1621_v58 = vsel %vm1456_vm8, nan, %v1620_v26 }
  0xf4   :  { %1623 = vst [vmem:[#allocation5 + $0x88] sm:$0xff] %v1467_v38  ;;  %v1626_v21 = vmul.f32 2.0, %v1467_v38 }
  0xf5   :  { %1625 = vst [vmem:[#allocation5 + $0x90] sm:$0xff] %v1621_v58 }
  0xf6   :  { %v1627_v28 = vmul.f32 %v1626_v21, %v1621_v58  ;;  %v1630_v57 = vmul.f32 %v1626_v21, %v1467_v38 }
  0xf8   :  { %1629 = vst [vmem:[#allocation5 + $0x98] sm:$0xff] %v1627_v28  ;;  %v1631_v19 = vsub.f32 1.0, %v1630_v57 }
  0xfa   :  { %1633 = vst [vmem:[#allocation5 + $0xa0] sm:$0xff] %v1631_v19 }
  0xfb   :  { %1646 = dma.vmem_to_hbm [thread:$0]  %s1639_s11, 2688, %s1641_s14, [#allocation4], %s1755_s15, %s1755_s15, %s1756_s16  }
  0xfc   :  { %1744 = dma.done.wait [#allocation4], 2688  }
  0xfd   :  { %1745 = vsyncadd [#allocation4], 4294964608 }
  0xfe   :  { %1651 = vsyncpa [#allocation3], 1 }
  0xff   :  { %1652 = vsyncpa [#allocation4], 1 }

</bundles_post_ra>
